<compile_context>
chip_gen: v7x
topology: tpu7x:2x2x1
jax: 0.10.0
libtpu: 0.0.40
codegen_flags: <defaults>
</compile_context>

<pallas_src>
import math

import jax
import jax.numpy as jnp
from jax import lax
from jax.experimental import pallas as pl
from jax.experimental.pallas import tpu as pltpu

_NPER = 4  # refs per GRU layer: W_ih(D_l,3H), W_hh(H,3H), bias_i(1,3H), b_hn(1,H)


def _make_gru_kernel(n_layers, Bt, W, Tc, H, in_dims, matmul_dtype, n_sub):
    n_chunks = W // Tc
    Bsub = Bt // n_sub

    def kernel(*refs):
        x_ref = refs[0]                                            # (W, Bt, D) time-major
        layer_refs = [refs[1 + l * _NPER: 1 + (l + 1) * _NPER] for l in range(n_layers)]
        out_ref = refs[1 + n_layers * _NPER]                       # (W, Bt, H) time-major
        gi_ref = refs[2 + n_layers * _NPER]                        # (Tc, Bt, 3H) scratch
        seq_ref = refs[3 + n_layers * _NPER] if n_layers > 1 else None  # (W, Bt, H)

        for l in range(n_layers):
            w_ih_ref, w_hh_ref, bias_i_ref, b_hn_ref = layer_refs[l]
            d_in = in_dims[l]
            in_ref = x_ref if l == 0 else seq_ref
            dst_ref = out_ref if l == n_layers - 1 else seq_ref

            # Hoist loop-invariant loads / broadcasts off the serial path
            # (JAX does not CSE broadcast_in_dim).
            w_ih = w_ih_ref[...]                                   # (d_in, 3H)
            w_hh = w_hh_ref[...]                                   # (H, 3H), gates r|z|n fused
            bias_i = bias_i_ref[...]                               # (1, 3H) f32
            b_hn_b = jnp.broadcast_to(b_hn_ref[...], (Bsub, H))    # (Bsub, H) f32

            # Zero initial hidden state per layer; carry stays f32 across all steps.
            hs = tuple(jnp.zeros((Bsub, H), jnp.float32) for _ in range(n_sub))

            for c in range(n_chunks):
                t0 = c * Tc
                # Hoisted input-to-hidden projection for this time chunk: one matmul
                # with M = Tc*Bt covering Tc timesteps (off the recurrence).
                chunk_in = in_ref[t0:t0 + Tc]                      # (Tc, Bt, d_in)
                gi = jnp.dot(
                    chunk_in.reshape(Tc * Bt, d_in).astype(matmul_dtype),
                    w_ih, preferred_element_type=jnp.float32) + bias_i
                gi_ref[...] = gi.reshape(Tc, Bt, 3 * H).astype(gi_ref.dtype)

                def step(t, hs, t0=t0):
                    # Leading-axis slice: clean, contiguous (Bt, 3H) slab.
                    gi_t = gi_ref[t].astype(jnp.float32)
                    new_hs = []
                    for s in range(n_sub):  # interleave independent batch sub-tiles
                        lo = s * Bsub
                        h = hs[s]
                        gi_s = gi_t[lo:lo + Bsub]
                        # Single fused hidden-to-hidden dot for all three gates.
                        gh = jnp.dot(h.astype(matmul_dtype), w_hh,
                                     preferred_element_type=jnp.float32)
                        # One sigmoid over the contiguous r|z slab.
                        rz = jax.nn.sigmoid(gi_s[:, :2 * H] + gh[:, :2 * H])
                        r, z = rz[:, :H], rz[:, H:]
                        n = jnp.tanh(gi_s[:, 2 * H:] + r * (gh[:, 2 * H:] + b_hn_b))
                        h_new = (1.0 - z) * n + z * h
                        # Time-major store: full (Bsub, H) rows at leading index t0+t.
                        dst_ref[pl.ds(t0 + t, 1), lo:lo + Bsub, :] = (
                            h_new.astype(dst_ref.dtype)[None])
                        new_hs.append(h_new)
                    return tuple(new_hs)

                if Tc <= 16:
                    for t in range(Tc):                 # full unroll for short chunks
                        hs = step(t, hs)
                else:
                    hs = lax.fori_loop(0, Tc, step, hs, unroll=2)

            # TODO(synk): training-mode inter-layer dropout (n_layers > 1, dropout > 0)
            # is not implemented; results match eval-mode semantics.

    return kernel


def _dtype_bytes(dt):
    return jnp.dtype(dt).itemsize


def _pick_time_chunk(W, max_chunk=64):
    """Largest divisor of W <= max_chunk, so the GI scratch is bounded in VMEM."""
    if W <= max_chunk:
        return W
    for c in range(max_chunk, 0, -1):
        if W % c == 0:
            return c if c >= 16 else W
    return W


def _vmem_estimate_bytes(Bt, W, Tc, H, in_dims, n_layers, mm_bytes):
    est = 2 * W * Bt * in_dims[0] * mm_bytes           # double-buffered x block
    est += 2 * W * Bt * H * 4                          # double-buffered f32 out block
    for d_in in in_dims:                               # double-buffered weights/biases
        est += 2 * ((d_in + H) * 3 * H * mm_bytes + 4 * H * 4)
    est += Tc * Bt * 3 * H * mm_bytes                  # GI scratch
    if n_layers > 1:
        est += W * Bt * H * mm_bytes                   # inter-layer sequence scratch
    return est


def _pick_batch_tile(B, est_fn, budget):
    cands = [c for c in range(8, min(B, 256) + 1, 8) if B % c == 0]
    if not cands:
        cands = [B]                                    # tiny batch: whole batch per step
    # Prefer grid >= 2 so the "parallel" batch axis can shard across v7x's two cores.
    pref = [c for c in cands if B // c >= 2] or cands
    fits = [c for c in pref if est_fn(c) <= budget]
    return max(fits) if fits else min(pref)


def init_params(key, in_dim, hid_dim, n_layers):
    """Deterministic init mimicking PyTorch GRU uniform(-1/sqrt(H), 1/sqrt(H))."""
    std = 1.0 / math.sqrt(hid_dim)
    keys = jax.random.split(key, 4 * n_layers)
    ki = 0
    gru = []
    for l in range(n_layers):
        d_in = in_dim if l == 0 else hid_dim
        w_ih = jax.random.uniform(keys[ki], (3 * hid_dim, d_in), jnp.float32, -std, std); ki += 1
        w_hh = jax.random.uniform(keys[ki], (3 * hid_dim, hid_dim), jnp.float32, -std, std); ki += 1
        b_ih = jax.random.uniform(keys[ki], (3 * hid_dim,), jnp.float32, -std, std); ki += 1
        b_hh = jax.random.uniform(keys[ki], (3 * hid_dim,), jnp.float32, -std, std); ki += 1
        gru.append((w_ih, w_hh, b_ih, b_hh))
    return {"gru": gru}


def rnn_decoder_forward(x, params, matmul_dtype=jnp.float32, vmem_budget_bytes=40 << 20):
    """decoder_out, _ = nn.GRU(in_dim, hid_dim, n_layers, batch_first=True)(x)."""
    B, W, D = x.shape
    gru = params["gru"]
    n_layers = len(gru)
    H = gru[0][1].shape[1]
    in_dims = [D] + [H] * (n_layers - 1)
    mm_bytes = _dtype_bytes(matmul_dtype)

    Tc = _pick_time_chunk(W)
    est_fn = lambda bt: _vmem_estimate_bytes(bt, W, Tc, H, in_dims, n_layers, mm_bytes)
    Bt = _pick_batch_tile(B, est_fn, vmem_budget_bytes)
    grid = (B // Bt,)
    n_sub = 2 if Bt % 16 == 0 else 1   # interleave two recurrences to overlap MXU/EUP

    # Kernel consumes the sequence time-major (W, B, .): the per-step accesses become
    # contiguous leading-axis slabs.  Transpose in/out once here (wrapper-side layout
    # plumbing).  Note: H multiples of 128 keep the gate lane-slices tile-aligned.
    x_tm = jnp.transpose(x.astype(matmul_dtype), (1, 0, 2))        # (W, B, D)

    flat = [x_tm]
    in_specs = [pl.BlockSpec((W, Bt, D), lambda i: (0, i, 0))]
    for l, (w_ih, w_hh, b_ih, b_hh) in enumerate(gru):
        d_in = in_dims[l]
        # PyTorch stores gates row-stacked [r; z; n]; transpose -> columns r|z|n.
        w_ih_f = jnp.asarray(w_ih.T, matmul_dtype)                 # (D_l, 3H)
        w_hh_f = jnp.asarray(w_hh.T, matmul_dtype)                 # (H, 3H)
        bias_i = jnp.concatenate([
            b_ih[:H] + b_hh[:H],                                   # r: b_ir + b_hr
            b_ih[H:2 * H] + b_hh[H:2 * H],                         # z: b_iz + b_hz
            b_ih[2 * H:],                                          # n: b_in (b_hn kept apart)
        ]).reshape(1, 3 * H).astype(jnp.float32)
        b_hn = b_hh[2 * H:].reshape(1, H).astype(jnp.float32)
        flat += [w_ih_f, w_hh_f, bias_i, b_hn]
        in_specs += [
            pl.BlockSpec((d_in, 3 * H), lambda i: (0, 0)),
            pl.BlockSpec((H, 3 * H), lambda i: (0, 0)),
            pl.BlockSpec((1, 3 * H), lambda i: (0, 0)),
            pl.BlockSpec((1, H), lambda i: (0, 0)),
        ]

    scratch_shapes = [pltpu.VMEM((Tc, Bt, 3 * H), matmul_dtype)]   # time-chunked GI
    if n_layers > 1:
        scratch_shapes.append(pltpu.VMEM((W, Bt, H), matmul_dtype))  # inter-layer seq

    vmem_limit = int(min(max(est_fn(Bt) * 5 // 4 + (2 << 20), 32 << 20), 56 << 20))

    kernel = _make_gru_kernel(n_layers, Bt, W, Tc, H, in_dims, matmul_dtype, n_sub)
    out_tm = pl.pallas_call(
        kernel,
        out_shape=jax.ShapeDtypeStruct((W, B, H), jnp.float32),
        grid=grid,
        in_specs=in_specs,
        out_specs=pl.BlockSpec((W, Bt, H), lambda i: (0, i, 0)),
        scratch_shapes=scratch_shapes,
        compiler_params=pltpu.CompilerParams(
            dimension_semantics=("parallel",),
            vmem_limit_bytes=vmem_limit),
    )(*flat)
    return jnp.transpose(out_tm, (1, 0, 2))                        # back to (B, W, H)


def reference_forward(x, params):
    """Pure-JAX reference (same math as PyTorch GRU eval) for validation."""
    B, W, _ = x.shape
    H = params["gru"][0][1].shape[1]
    seq = x.astype(jnp.float32)
    for (w_ih, w_hh, b_ih, b_hh) in params["gru"]:
        h = jnp.zeros((B, H), jnp.float32)
        outs = []
        for t in range(W):
            x_t = seq[:, t, :]
            gi = x_t @ w_ih.T + b_ih
            gh = h @ w_hh.T + b_hh
            r = jax.nn.sigmoid(gi[:, :H] + gh[:, :H])
            z = jax.nn.sigmoid(gi[:, H:2 * H] + gh[:, H:2 * H])
            n = jnp.tanh(gi[:, 2 * H:] + r * gh[:, 2 * H:])
            h = (1.0 - z) * n + z * h
            outs.append(h)
        seq = jnp.stack(outs, axis=1)
    return seq


if __name__ == "__main__":
    key = jax.random.PRNGKey(0)

    # --- Config A: small shapes consistent with RNNDecoder; exact f32 validation. ---
    B, seq_len, in_dim, hid_dim, n_layers = 2, 8, 4, 32, 2
    kx, kp, kx2, kp2 = jax.random.split(key, 4)
    x = jax.random.normal(kx, (B, seq_len, in_dim), jnp.float32)
    params = init_params(kp, in_dim, hid_dim, n_layers)
    ref = reference_forward(x, params)

    out = jax.block_until_ready(rnn_decoder_forward(x, params, matmul_dtype=jnp.float32))
    assert out.shape == (B, seq_len, hid_dim), out.shape
    err = float(jnp.max(jnp.abs(out - ref)))
    assert jnp.allclose(out, ref, atol=1e-4, rtol=1e-4), err

    # --- Config B: recommended fast path on v6e/v7x (bf16 matmuls, f32 gate math). ---
    out_bf = jax.block_until_ready(rnn_decoder_forward(x, params, matmul_dtype=jnp.bfloat16))
    err_bf = float(jnp.max(jnp.abs(out_bf - ref)))
    assert jnp.allclose(out_bf, ref, atol=1.5e-1, rtol=1.5e-1), err_bf

    # --- Config C: exercises Bt=16, grid=2 ("parallel" batch axis), interleaved
    #     (n_sub=2) recurrences and the inter-layer sequence scratch, still f32. ---
    B2, W2, D2, H2 = 32, 16, 16, 64
    x2 = jax.random.normal(kx2, (B2, W2, D2), jnp.float32)
    params2 = init_params(kp2, D2, H2, 2)
    ref2 = reference_forward(x2, params2)
    out2 = jax.block_until_ready(rnn_decoder_forward(x2, params2, matmul_dtype=jnp.float32))
    err2 = float(jnp.max(jnp.abs(out2 - ref2)))
    assert jnp.allclose(out2, ref2, atol=1e-4, rtol=1e-4), err2

    print("KERNEL_OK")
</pallas_src>

<mosaic_0001>
module attributes {stable_mosaic.version = 11 : i64} {
  func.func @kernel(%arg0: i32, %arg1: memref<8x2x4xf32, #tpu.memory_space<vmem>>, %arg2: memref<4x96xf32, #tpu.memory_space<vmem>>, %arg3: memref<32x96xf32, #tpu.memory_space<vmem>>, %arg4: memref<1x96xf32, #tpu.memory_space<vmem>>, %arg5: memref<1x32xf32, #tpu.memory_space<vmem>>, %arg6: memref<32x96xf32, #tpu.memory_space<vmem>>, %arg7: memref<32x96xf32, #tpu.memory_space<vmem>>, %arg8: memref<1x96xf32, #tpu.memory_space<vmem>>, %arg9: memref<1x32xf32, #tpu.memory_space<vmem>>, %arg10: memref<8x2x32xf32, #tpu.memory_space<vmem>>, %arg11: memref<8x2x96xf32, #tpu.memory_space<vmem>>, %arg12: memref<8x2x32xf32, #tpu.memory_space<vmem>>) attributes {dimension_semantics = [#tpu.dimension_semantics<parallel>], iteration_bounds = array<i64: 1>, scalar_prefetch = 0 : i64, scratch_operands = 2 : i64, tpu.core_type = #tpu.core_type<tc>, window_params = [{transform_indices = @transform_0, window_bounds = array<i64: 8, 2, 4>}, {pipeline_mode = #tpu.pipeline_mode<synchronous>, transform_indices = @transform_1, window_bounds = array<i64: 4, 96>}, {pipeline_mode = #tpu.pipeline_mode<synchronous>, transform_indices = @transform_2, window_bounds = array<i64: 32, 96>}, {pipeline_mode = #tpu.pipeline_mode<synchronous>, transform_indices = @transform_3, window_bounds = array<i64: 1, 96>}, {pipeline_mode = #tpu.pipeline_mode<synchronous>, transform_indices = @transform_4, window_bounds = array<i64: 1, 32>}, {pipeline_mode = #tpu.pipeline_mode<synchronous>, transform_indices = @transform_5, window_bounds = array<i64: 32, 96>}, {pipeline_mode = #tpu.pipeline_mode<synchronous>, transform_indices = @transform_6, window_bounds = array<i64: 32, 96>}, {pipeline_mode = #tpu.pipeline_mode<synchronous>, transform_indices = @transform_7, window_bounds = array<i64: 1, 96>}, {pipeline_mode = #tpu.pipeline_mode<synchronous>, transform_indices = @transform_8, window_bounds = array<i64: 1, 32>}, {transform_indices = @transform_9, window_bounds = array<i64: 8, 2, 32>}]} {
    %c0 = arith.constant 0 : index
    %c0_0 = arith.constant 0 : index
    %0 = vector.load %arg2[%c0, %c0_0] : memref<4x96xf32, #tpu.memory_space<vmem>>, vector<4x96xf32>
    %c0_1 = arith.constant 0 : index
    %c0_2 = arith.constant 0 : index
    %1 = vector.load %arg3[%c0_1, %c0_2] : memref<32x96xf32, #tpu.memory_space<vmem>>, vector<32x96xf32>
    %c0_3 = arith.constant 0 : index
    %c0_4 = arith.constant 0 : index
    %2 = vector.load %arg4[%c0_3, %c0_4] : memref<1x96xf32, #tpu.memory_space<vmem>>, vector<1x96xf32>
    %c0_5 = arith.constant 0 : index
    %c0_6 = arith.constant 0 : index
    %3 = vector.load %arg5[%c0_5, %c0_6] : memref<1x32xf32, #tpu.memory_space<vmem>>, vector<1x32xf32>
    %4 = vector.shape_cast %3 : vector<1x32xf32> to vector<1x32xf32>
    %5 = vector.broadcast %4 : vector<1x32xf32> to vector<2x32xf32>
    %cst = arith.constant 0.000000e+00 : f32
    %6 = vector.broadcast %cst : f32 to vector<2x32xf32>
    %c0_7 = arith.constant 0 : index
    %c0_8 = arith.constant 0 : index
    %c0_9 = arith.constant 0 : index
    %7 = vector.load %arg1[%c0_7, %c0_8, %c0_9] : memref<8x2x4xf32, #tpu.memory_space<vmem>>, vector<8x2x4xf32>
    %8 = vector.shape_cast %7 : vector<8x2x4xf32> to vector<16x4xf32>
    %cst_10 = arith.constant dense<0.000000e+00> : vector<16x96xf32>
    %9 = tpu.matmul %8, %0, %cst_10 {dimension_numbers = #tpu.dot_dimension_numbers<[1], [0], [0], [1], [0, 0, 1, 1], [], []>} : vector<16x4xf32>, vector<4x96xf32>, vector<16x96xf32> -> vector<16x96xf32>
    %10 = vector.broadcast %2 : vector<1x96xf32> to vector<16x96xf32>
    %11 = arith.addf %9, %10 : vector<16x96xf32>
    %12 = vector.shape_cast %11 : vector<16x96xf32> to vector<8x2x96xf32>
    %c0_11 = arith.constant 0 : index
    %c0_12 = arith.constant 0 : index
    %c0_13 = arith.constant 0 : index
    %13 = vector.load %arg11[%c0_11, %c0_12, %c0_13] : memref<8x2x96xf32, #tpu.memory_space<vmem>>, vector<8x2x96xf32>
    tpu.vector_store %arg11[%c0_11, %c0_12, %c0_13], %12 {strides = array<i32>} : memref<8x2x96xf32, #tpu.memory_space<vmem>>, vector<8x2x96xf32>,
    %c0_14 = arith.constant 0 : index
    %c0_15 = arith.constant 0 : index
    %c0_16 = arith.constant 0 : index
    %14 = vector.load %arg11[%c0_14, %c0_15, %c0_16] : memref<8x2x96xf32, #tpu.memory_space<vmem>>, vector<1x2x96xf32>
    %15 = vector.shape_cast %14 : vector<1x2x96xf32> to vector<2x96xf32>
    %cst_17 = arith.constant dense<0.000000e+00> : vector<2x96xf32>
    %16 = tpu.matmul %6, %1, %cst_17 {dimension_numbers = #tpu.dot_dimension_numbers<[1], [0], [0], [1], [0, 0, 1, 1], [], []>} : vector<2x32xf32>, vector<32x96xf32>, vector<2x96xf32> -> vector<2x96xf32>
    %17 = vector.extract_strided_slice %15 {offsets = [0, 0], sizes = [2, 64], strides = [1, 1]} : vector<2x96xf32> to vector<2x64xf32>
    %18 = vector.extract_strided_slice %16 {offsets = [0, 0], sizes = [2, 64], strides = [1, 1]} : vector<2x96xf32> to vector<2x64xf32>
    %19 = arith.addf %17, %18 : vector<2x64xf32>
    %20 = arith.negf %19 : vector<2x64xf32>
    %21 = math.exp %20 : vector<2x64xf32>
    %cst_18 = arith.constant 1.000000e+00 : f32
    %22 = vector.broadcast %cst_18 : f32 to vector<2x64xf32>
    %23 = arith.addf %22, %21 : vector<2x64xf32>
    %24 = arith.divf %22, %23 : vector<2x64xf32>
    %25 = vector.extract_strided_slice %24 {offsets = [0, 0], sizes = [2, 32], strides = [1, 1]} : vector<2x64xf32> to vector<2x32xf32>
    %26 = vector.extract_strided_slice %24 {offsets = [0, 32], sizes = [2, 32], strides = [1, 1]} : vector<2x64xf32> to vector<2x32xf32>
    %27 = vector.extract_strided_slice %15 {offsets = [0, 64], sizes = [2, 32], strides = [1, 1]} : vector<2x96xf32> to vector<2x32xf32>
    %28 = vector.extract_strided_slice %16 {offsets = [0, 64], sizes = [2, 32], strides = [1, 1]} : vector<2x96xf32> to vector<2x32xf32>
    %29 = arith.addf %28, %5 : vector<2x32xf32>
    %30 = arith.mulf %25, %29 : vector<2x32xf32>
    %31 = arith.addf %27, %30 : vector<2x32xf32>
    %32 = math.tanh %31 : vector<2x32xf32>
    %cst_19 = arith.constant 1.000000e+00 : f32
    %33 = vector.broadcast %cst_19 : f32 to vector<2x32xf32>
    %34 = arith.subf %33, %26 : vector<2x32xf32>
    %35 = arith.mulf %34, %32 : vector<2x32xf32>
    %36 = arith.mulf %26, %6 : vector<2x32xf32>
    %37 = arith.addf %35, %36 : vector<2x32xf32>
    %38 = vector.shape_cast %37 : vector<2x32xf32> to vector<1x2x32xf32>
    %c0_20 = arith.constant 0 : index
    %c0_21 = arith.constant 0 : index
    %c0_22 = arith.constant 0 : index
    %39 = vector.load %arg12[%c0_20, %c0_21, %c0_22] : memref<8x2x32xf32, #tpu.memory_space<vmem>>, vector<1x2x32xf32>
    tpu.vector_store %arg12[%c0_20, %c0_21, %c0_22], %38 {strides = array<i32>} : memref<8x2x32xf32, #tpu.memory_space<vmem>>, vector<1x2x32xf32>,
    %c1 = arith.constant 1 : index
    %c0_23 = arith.constant 0 : index
    %c0_24 = arith.constant 0 : index
    %40 = vector.load %arg11[%c1, %c0_23, %c0_24] : memref<8x2x96xf32, #tpu.memory_space<vmem>>, vector<1x2x96xf32>
    %41 = vector.shape_cast %40 : vector<1x2x96xf32> to vector<2x96xf32>
    %cst_25 = arith.constant dense<0.000000e+00> : vector<2x96xf32>
    %42 = tpu.matmul %37, %1, %cst_25 {dimension_numbers = #tpu.dot_dimension_numbers<[1], [0], [0], [1], [0, 0, 1, 1], [], []>} : vector<2x32xf32>, vector<32x96xf32>, vector<2x96xf32> -> vector<2x96xf32>
    %43 = vector.extract_strided_slice %41 {offsets = [0, 0], sizes = [2, 64], strides = [1, 1]} : vector<2x96xf32> to vector<2x64xf32>
    %44 = vector.extract_strided_slice %42 {offsets = [0, 0], sizes = [2, 64], strides = [1, 1]} : vector<2x96xf32> to vector<2x64xf32>
    %45 = arith.addf %43, %44 : vector<2x64xf32>
    %46 = arith.negf %45 : vector<2x64xf32>
    %47 = math.exp %46 : vector<2x64xf32>
    %cst_26 = arith.constant 1.000000e+00 : f32
    %48 = vector.broadcast %cst_26 : f32 to vector<2x64xf32>
    %49 = arith.addf %48, %47 : vector<2x64xf32>
    %50 = arith.divf %48, %49 : vector<2x64xf32>
    %51 = vector.extract_strided_slice %50 {offsets = [0, 0], sizes = [2, 32], strides = [1, 1]} : vector<2x64xf32> to vector<2x32xf32>
    %52 = vector.extract_strided_slice %50 {offsets = [0, 32], sizes = [2, 32], strides = [1, 1]} : vector<2x64xf32> to vector<2x32xf32>
    %53 = vector.extract_strided_slice %41 {offsets = [0, 64], sizes = [2, 32], strides = [1, 1]} : vector<2x96xf32> to vector<2x32xf32>
    %54 = vector.extract_strided_slice %42 {offsets = [0, 64], sizes = [2, 32], strides = [1, 1]} : vector<2x96xf32> to vector<2x32xf32>
    %55 = arith.addf %54, %5 : vector<2x32xf32>
    %56 = arith.mulf %51, %55 : vector<2x32xf32>
    %57 = arith.addf %53, %56 : vector<2x32xf32>
    %58 = math.tanh %57 : vector<2x32xf32>
    %cst_27 = arith.constant 1.000000e+00 : f32
    %59 = vector.broadcast %cst_27 : f32 to vector<2x32xf32>
    %60 = arith.subf %59, %52 : vector<2x32xf32>
    %61 = arith.mulf %60, %58 : vector<2x32xf32>
    %62 = arith.mulf %52, %37 : vector<2x32xf32>
    %63 = arith.addf %61, %62 : vector<2x32xf32>
    %64 = vector.shape_cast %63 : vector<2x32xf32> to vector<1x2x32xf32>
    %c1_28 = arith.constant 1 : index
    %c0_29 = arith.constant 0 : index
    %c0_30 = arith.constant 0 : index
    %65 = vector.load %arg12[%c1_28, %c0_29, %c0_30] : memref<8x2x32xf32, #tpu.memory_space<vmem>>, vector<1x2x32xf32>
    tpu.vector_store %arg12[%c1_28, %c0_29, %c0_30], %64 {strides = array<i32>} : memref<8x2x32xf32, #tpu.memory_space<vmem>>, vector<1x2x32xf32>,
    %c2 = arith.constant 2 : index
    %c0_31 = arith.constant 0 : index
    %c0_32 = arith.constant 0 : index
    %66 = vector.load %arg11[%c2, %c0_31, %c0_32] : memref<8x2x96xf32, #tpu.memory_space<vmem>>, vector<1x2x96xf32>
    %67 = vector.shape_cast %66 : vector<1x2x96xf32> to vector<2x96xf32>
    %cst_33 = arith.constant dense<0.000000e+00> : vector<2x96xf32>
    %68 = tpu.matmul %63, %1, %cst_33 {dimension_numbers = #tpu.dot_dimension_numbers<[1], [0], [0], [1], [0, 0, 1, 1], [], []>} : vector<2x32xf32>, vector<32x96xf32>, vector<2x96xf32> -> vector<2x96xf32>
    %69 = vector.extract_strided_slice %67 {offsets = [0, 0], sizes = [2, 64], strides = [1, 1]} : vector<2x96xf32> to vector<2x64xf32>
    %70 = vector.extract_strided_slice %68 {offsets = [0, 0], sizes = [2, 64], strides = [1, 1]} : vector<2x96xf32> to vector<2x64xf32>
    %71 = arith.addf %69, %70 : vector<2x64xf32>
    %72 = arith.negf %71 : vector<2x64xf32>
    %73 = math.exp %72 : vector<2x64xf32>
    %cst_34 = arith.constant 1.000000e+00 : f32
    %74 = vector.broadcast %cst_34 : f32 to vector<2x64xf32>
    %75 = arith.addf %74, %73 : vector<2x64xf32>
    %76 = arith.divf %74, %75 : vector<2x64xf32>
    %77 = vector.extract_strided_slice %76 {offsets = [0, 0], sizes = [2, 32], strides = [1, 1]} : vector<2x64xf32> to vector<2x32xf32>
    %78 = vector.extract_strided_slice %76 {offsets = [0, 32], sizes = [2, 32], strides = [1, 1]} : vector<2x64xf32> to vector<2x32xf32>
    %79 = vector.extract_strided_slice %67 {offsets = [0, 64], sizes = [2, 32], strides = [1, 1]} : vector<2x96xf32> to vector<2x32xf32>
    %80 = vector.extract_strided_slice %68 {offsets = [0, 64], sizes = [2, 32], strides = [1, 1]} : vector<2x96xf32> to vector<2x32xf32>
    %81 = arith.addf %80, %5 : vector<2x32xf32>
    %82 = arith.mulf %77, %81 : vector<2x32xf32>
    %83 = arith.addf %79, %82 : vector<2x32xf32>
    %84 = math.tanh %83 : vector<2x32xf32>
    %cst_35 = arith.constant 1.000000e+00 : f32
    %85 = vector.broadcast %cst_35 : f32 to vector<2x32xf32>
    %86 = arith.subf %85, %78 : vector<2x32xf32>
    %87 = arith.mulf %86, %84 : vector<2x32xf32>
    %88 = arith.mulf %78, %63 : vector<2x32xf32>
    %89 = arith.addf %87, %88 : vector<2x32xf32>
    %90 = vector.shape_cast %89 : vector<2x32xf32> to vector<1x2x32xf32>
    %c2_36 = arith.constant 2 : index
    %c0_37 = arith.constant 0 : index
    %c0_38 = arith.constant 0 : index
    %91 = vector.load %arg12[%c2_36, %c0_37, %c0_38] : memref<8x2x32xf32, #tpu.memory_space<vmem>>, vector<1x2x32xf32>
    tpu.vector_store %arg12[%c2_36, %c0_37, %c0_38], %90 {strides = array<i32>} : memref<8x2x32xf32, #tpu.memory_space<vmem>>, vector<1x2x32xf32>,
    %c3 = arith.constant 3 : index
    %c0_39 = arith.constant 0 : index
    %c0_40 = arith.constant 0 : index
    %92 = vector.load %arg11[%c3, %c0_39, %c0_40] : memref<8x2x96xf32, #tpu.memory_space<vmem>>, vector<1x2x96xf32>
    %93 = vector.shape_cast %92 : vector<1x2x96xf32> to vector<2x96xf32>
    %cst_41 = arith.constant dense<0.000000e+00> : vector<2x96xf32>
    %94 = tpu.matmul %89, %1, %cst_41 {dimension_numbers = #tpu.dot_dimension_numbers<[1], [0], [0], [1], [0, 0, 1, 1], [], []>} : vector<2x32xf32>, vector<32x96xf32>, vector<2x96xf32> -> vector<2x96xf32>
    %95 = vector.extract_strided_slice %93 {offsets = [0, 0], sizes = [2, 64], strides = [1, 1]} : vector<2x96xf32> to vector<2x64xf32>
    %96 = vector.extract_strided_slice %94 {offsets = [0, 0], sizes = [2, 64], strides = [1, 1]} : vector<2x96xf32> to vector<2x64xf32>
    %97 = arith.addf %95, %96 : vector<2x64xf32>
    %98 = arith.negf %97 : vector<2x64xf32>
    %99 = math.exp %98 : vector<2x64xf32>
    %cst_42 = arith.constant 1.000000e+00 : f32
    %100 = vector.broadcast %cst_42 : f32 to vector<2x64xf32>
    %101 = arith.addf %100, %99 : vector<2x64xf32>
    %102 = arith.divf %100, %101 : vector<2x64xf32>
    %103 = vector.extract_strided_slice %102 {offsets = [0, 0], sizes = [2, 32], strides = [1, 1]} : vector<2x64xf32> to vector<2x32xf32>
    %104 = vector.extract_strided_slice %102 {offsets = [0, 32], sizes = [2, 32], strides = [1, 1]} : vector<2x64xf32> to vector<2x32xf32>
    %105 = vector.extract_strided_slice %93 {offsets = [0, 64], sizes = [2, 32], strides = [1, 1]} : vector<2x96xf32> to vector<2x32xf32>
    %106 = vector.extract_strided_slice %94 {offsets = [0, 64], sizes = [2, 32], strides = [1, 1]} : vector<2x96xf32> to vector<2x32xf32>
    %107 = arith.addf %106, %5 : vector<2x32xf32>
    %108 = arith.mulf %103, %107 : vector<2x32xf32>
    %109 = arith.addf %105, %108 : vector<2x32xf32>
    %110 = math.tanh %109 : vector<2x32xf32>
    %cst_43 = arith.constant 1.000000e+00 : f32
    %111 = vector.broadcast %cst_43 : f32 to vector<2x32xf32>
    %112 = arith.subf %111, %104 : vector<2x32xf32>
    %113 = arith.mulf %112, %110 : vector<2x32xf32>
    %114 = arith.mulf %104, %89 : vector<2x32xf32>
    %115 = arith.addf %113, %114 : vector<2x32xf32>
    %116 = vector.shape_cast %115 : vector<2x32xf32> to vector<1x2x32xf32>
    %c3_44 = arith.constant 3 : index
    %c0_45 = arith.constant 0 : index
    %c0_46 = arith.constant 0 : index
    %117 = vector.load %arg12[%c3_44, %c0_45, %c0_46] : memref<8x2x32xf32, #tpu.memory_space<vmem>>, vector<1x2x32xf32>
    tpu.vector_store %arg12[%c3_44, %c0_45, %c0_46], %116 {strides = array<i32>} : memref<8x2x32xf32, #tpu.memory_space<vmem>>, vector<1x2x32xf32>,
    %c4 = arith.constant 4 : index
    %c0_47 = arith.constant 0 : index
    %c0_48 = arith.constant 0 : index
    %118 = vector.load %arg11[%c4, %c0_47, %c0_48] : memref<8x2x96xf32, #tpu.memory_space<vmem>>, vector<1x2x96xf32>
    %119 = vector.shape_cast %118 : vector<1x2x96xf32> to vector<2x96xf32>
    %cst_49 = arith.constant dense<0.000000e+00> : vector<2x96xf32>
    %120 = tpu.matmul %115, %1, %cst_49 {dimension_numbers = #tpu.dot_dimension_numbers<[1], [0], [0], [1], [0, 0, 1, 1], [], []>} : vector<2x32xf32>, vector<32x96xf32>, vector<2x96xf32> -> vector<2x96xf32>
    %121 = vector.extract_strided_slice %119 {offsets = [0, 0], sizes = [2, 64], strides = [1, 1]} : vector<2x96xf32> to vector<2x64xf32>
    %122 = vector.extract_strided_slice %120 {offsets = [0, 0], sizes = [2, 64], strides = [1, 1]} : vector<2x96xf32> to vector<2x64xf32>
    %123 = arith.addf %121, %122 : vector<2x64xf32>
    %124 = arith.negf %123 : vector<2x64xf32>
    %125 = math.exp %124 : vector<2x64xf32>
    %cst_50 = arith.constant 1.000000e+00 : f32
    %126 = vector.broadcast %cst_50 : f32 to vector<2x64xf32>
    %127 = arith.addf %126, %125 : vector<2x64xf32>
    %128 = arith.divf %126, %127 : vector<2x64xf32>
    %129 = vector.extract_strided_slice %128 {offsets = [0, 0], sizes = [2, 32], strides = [1, 1]} : vector<2x64xf32> to vector<2x32xf32>
    %130 = vector.extract_strided_slice %128 {offsets = [0, 32], sizes = [2, 32], strides = [1, 1]} : vector<2x64xf32> to vector<2x32xf32>
    %131 = vector.extract_strided_slice %119 {offsets = [0, 64], sizes = [2, 32], strides = [1, 1]} : vector<2x96xf32> to vector<2x32xf32>
    %132 = vector.extract_strided_slice %120 {offsets = [0, 64], sizes = [2, 32], strides = [1, 1]} : vector<2x96xf32> to vector<2x32xf32>
    %133 = arith.addf %132, %5 : vector<2x32xf32>
    %134 = arith.mulf %129, %133 : vector<2x32xf32>
    %135 = arith.addf %131, %134 : vector<2x32xf32>
    %136 = math.tanh %135 : vector<2x32xf32>
    %cst_51 = arith.constant 1.000000e+00 : f32
    %137 = vector.broadcast %cst_51 : f32 to vector<2x32xf32>
    %138 = arith.subf %137, %130 : vector<2x32xf32>
    %139 = arith.mulf %138, %136 : vector<2x32xf32>
    %140 = arith.mulf %130, %115 : vector<2x32xf32>
    %141 = arith.addf %139, %140 : vector<2x32xf32>
    %142 = vector.shape_cast %141 : vector<2x32xf32> to vector<1x2x32xf32>
    %c4_52 = arith.constant 4 : index
    %c0_53 = arith.constant 0 : index
    %c0_54 = arith.constant 0 : index
    %143 = vector.load %arg12[%c4_52, %c0_53, %c0_54] : memref<8x2x32xf32, #tpu.memory_space<vmem>>, vector<1x2x32xf32>
    tpu.vector_store %arg12[%c4_52, %c0_53, %c0_54], %142 {strides = array<i32>} : memref<8x2x32xf32, #tpu.memory_space<vmem>>, vector<1x2x32xf32>,
    %c5 = arith.constant 5 : index
    %c0_55 = arith.constant 0 : index
    %c0_56 = arith.constant 0 : index
    %144 = vector.load %arg11[%c5, %c0_55, %c0_56] : memref<8x2x96xf32, #tpu.memory_space<vmem>>, vector<1x2x96xf32>
    %145 = vector.shape_cast %144 : vector<1x2x96xf32> to vector<2x96xf32>
    %cst_57 = arith.constant dense<0.000000e+00> : vector<2x96xf32>
    %146 = tpu.matmul %141, %1, %cst_57 {dimension_numbers = #tpu.dot_dimension_numbers<[1], [0], [0], [1], [0, 0, 1, 1], [], []>} : vector<2x32xf32>, vector<32x96xf32>, vector<2x96xf32> -> vector<2x96xf32>
    %147 = vector.extract_strided_slice %145 {offsets = [0, 0], sizes = [2, 64], strides = [1, 1]} : vector<2x96xf32> to vector<2x64xf32>
    %148 = vector.extract_strided_slice %146 {offsets = [0, 0], sizes = [2, 64], strides = [1, 1]} : vector<2x96xf32> to vector<2x64xf32>
    %149 = arith.addf %147, %148 : vector<2x64xf32>
    %150 = arith.negf %149 : vector<2x64xf32>
    %151 = math.exp %150 : vector<2x64xf32>
    %cst_58 = arith.constant 1.000000e+00 : f32
    %152 = vector.broadcast %cst_58 : f32 to vector<2x64xf32>
    %153 = arith.addf %152, %151 : vector<2x64xf32>
    %154 = arith.divf %152, %153 : vector<2x64xf32>
    %155 = vector.extract_strided_slice %154 {offsets = [0, 0], sizes = [2, 32], strides = [1, 1]} : vector<2x64xf32> to vector<2x32xf32>
    %156 = vector.extract_strided_slice %154 {offsets = [0, 32], sizes = [2, 32], strides = [1, 1]} : vector<2x64xf32> to vector<2x32xf32>
    %157 = vector.extract_strided_slice %145 {offsets = [0, 64], sizes = [2, 32], strides = [1, 1]} : vector<2x96xf32> to vector<2x32xf32>
    %158 = vector.extract_strided_slice %146 {offsets = [0, 64], sizes = [2, 32], strides = [1, 1]} : vector<2x96xf32> to vector<2x32xf32>
    %159 = arith.addf %158, %5 : vector<2x32xf32>
    %160 = arith.mulf %155, %159 : vector<2x32xf32>
    %161 = arith.addf %157, %160 : vector<2x32xf32>
    %162 = math.tanh %161 : vector<2x32xf32>
    %cst_59 = arith.constant 1.000000e+00 : f32
    %163 = vector.broadcast %cst_59 : f32 to vector<2x32xf32>
    %164 = arith.subf %163, %156 : vector<2x32xf32>
    %165 = arith.mulf %164, %162 : vector<2x32xf32>
    %166 = arith.mulf %156, %141 : vector<2x32xf32>
    %167 = arith.addf %165, %166 : vector<2x32xf32>
    %168 = vector.shape_cast %167 : vector<2x32xf32> to vector<1x2x32xf32>
    %c5_60 = arith.constant 5 : index
    %c0_61 = arith.constant 0 : index
    %c0_62 = arith.constant 0 : index
    %169 = vector.load %arg12[%c5_60, %c0_61, %c0_62] : memref<8x2x32xf32, #tpu.memory_space<vmem>>, vector<1x2x32xf32>
    tpu.vector_store %arg12[%c5_60, %c0_61, %c0_62], %168 {strides = array<i32>} : memref<8x2x32xf32, #tpu.memory_space<vmem>>, vector<1x2x32xf32>,
    %c6 = arith.constant 6 : index
    %c0_63 = arith.constant 0 : index
    %c0_64 = arith.constant 0 : index
    %170 = vector.load %arg11[%c6, %c0_63, %c0_64] : memref<8x2x96xf32, #tpu.memory_space<vmem>>, vector<1x2x96xf32>
    %171 = vector.shape_cast %170 : vector<1x2x96xf32> to vector<2x96xf32>
    %cst_65 = arith.constant dense<0.000000e+00> : vector<2x96xf32>
    %172 = tpu.matmul %167, %1, %cst_65 {dimension_numbers = #tpu.dot_dimension_numbers<[1], [0], [0], [1], [0, 0, 1, 1], [], []>} : vector<2x32xf32>, vector<32x96xf32>, vector<2x96xf32> -> vector<2x96xf32>
    %173 = vector.extract_strided_slice %171 {offsets = [0, 0], sizes = [2, 64], strides = [1, 1]} : vector<2x96xf32> to vector<2x64xf32>
    %174 = vector.extract_strided_slice %172 {offsets = [0, 0], sizes = [2, 64], strides = [1, 1]} : vector<2x96xf32> to vector<2x64xf32>
    %175 = arith.addf %173, %174 : vector<2x64xf32>
    %176 = arith.negf %175 : vector<2x64xf32>
    %177 = math.exp %176 : vector<2x64xf32>
    %cst_66 = arith.constant 1.000000e+00 : f32
    %178 = vector.broadcast %cst_66 : f32 to vector<2x64xf32>
    %179 = arith.addf %178, %177 : vector<2x64xf32>
    %180 = arith.divf %178, %179 : vector<2x64xf32>
    %181 = vector.extract_strided_slice %180 {offsets = [0, 0], sizes = [2, 32], strides = [1, 1]} : vector<2x64xf32> to vector<2x32xf32>
    %182 = vector.extract_strided_slice %180 {offsets = [0, 32], sizes = [2, 32], strides = [1, 1]} : vector<2x64xf32> to vector<2x32xf32>
    %183 = vector.extract_strided_slice %171 {offsets = [0, 64], sizes = [2, 32], strides = [1, 1]} : vector<2x96xf32> to vector<2x32xf32>
    %184 = vector.extract_strided_slice %172 {offsets = [0, 64], sizes = [2, 32], strides = [1, 1]} : vector<2x96xf32> to vector<2x32xf32>
    %185 = arith.addf %184, %5 : vector<2x32xf32>
    %186 = arith.mulf %181, %185 : vector<2x32xf32>
    %187 = arith.addf %183, %186 : vector<2x32xf32>
    %188 = math.tanh %187 : vector<2x32xf32>
    %cst_67 = arith.constant 1.000000e+00 : f32
    %189 = vector.broadcast %cst_67 : f32 to vector<2x32xf32>
    %190 = arith.subf %189, %182 : vector<2x32xf32>
    %191 = arith.mulf %190, %188 : vector<2x32xf32>
    %192 = arith.mulf %182, %167 : vector<2x32xf32>
    %193 = arith.addf %191, %192 : vector<2x32xf32>
    %194 = vector.shape_cast %193 : vector<2x32xf32> to vector<1x2x32xf32>
    %c6_68 = arith.constant 6 : index
    %c0_69 = arith.constant 0 : index
    %c0_70 = arith.constant 0 : index
    %195 = vector.load %arg12[%c6_68, %c0_69, %c0_70] : memref<8x2x32xf32, #tpu.memory_space<vmem>>, vector<1x2x32xf32>
    tpu.vector_store %arg12[%c6_68, %c0_69, %c0_70], %194 {strides = array<i32>} : memref<8x2x32xf32, #tpu.memory_space<vmem>>, vector<1x2x32xf32>,
    %c7 = arith.constant 7 : index
    %c0_71 = arith.constant 0 : index
    %c0_72 = arith.constant 0 : index
    %196 = vector.load %arg11[%c7, %c0_71, %c0_72] : memref<8x2x96xf32, #tpu.memory_space<vmem>>, vector<1x2x96xf32>
    %197 = vector.shape_cast %196 : vector<1x2x96xf32> to vector<2x96xf32>
    %cst_73 = arith.constant dense<0.000000e+00> : vector<2x96xf32>
    %198 = tpu.matmul %193, %1, %cst_73 {dimension_numbers = #tpu.dot_dimension_numbers<[1], [0], [0], [1], [0, 0, 1, 1], [], []>} : vector<2x32xf32>, vector<32x96xf32>, vector<2x96xf32> -> vector<2x96xf32>
    %199 = vector.extract_strided_slice %197 {offsets = [0, 0], sizes = [2, 64], strides = [1, 1]} : vector<2x96xf32> to vector<2x64xf32>
    %200 = vector.extract_strided_slice %198 {offsets = [0, 0], sizes = [2, 64], strides = [1, 1]} : vector<2x96xf32> to vector<2x64xf32>
    %201 = arith.addf %199, %200 : vector<2x64xf32>
    %202 = arith.negf %201 : vector<2x64xf32>
    %203 = math.exp %202 : vector<2x64xf32>
    %cst_74 = arith.constant 1.000000e+00 : f32
    %204 = vector.broadcast %cst_74 : f32 to vector<2x64xf32>
    %205 = arith.addf %204, %203 : vector<2x64xf32>
    %206 = arith.divf %204, %205 : vector<2x64xf32>
    %207 = vector.extract_strided_slice %206 {offsets = [0, 0], sizes = [2, 32], strides = [1, 1]} : vector<2x64xf32> to vector<2x32xf32>
    %208 = vector.extract_strided_slice %206 {offsets = [0, 32], sizes = [2, 32], strides = [1, 1]} : vector<2x64xf32> to vector<2x32xf32>
    %209 = vector.extract_strided_slice %197 {offsets = [0, 64], sizes = [2, 32], strides = [1, 1]} : vector<2x96xf32> to vector<2x32xf32>
    %210 = vector.extract_strided_slice %198 {offsets = [0, 64], sizes = [2, 32], strides = [1, 1]} : vector<2x96xf32> to vector<2x32xf32>
    %211 = arith.addf %210, %5 : vector<2x32xf32>
    %212 = arith.mulf %207, %211 : vector<2x32xf32>
    %213 = arith.addf %209, %212 : vector<2x32xf32>
    %214 = math.tanh %213 : vector<2x32xf32>
    %cst_75 = arith.constant 1.000000e+00 : f32
    %215 = vector.broadcast %cst_75 : f32 to vector<2x32xf32>
    %216 = arith.subf %215, %208 : vector<2x32xf32>
    %217 = arith.mulf %216, %214 : vector<2x32xf32>
    %218 = arith.mulf %208, %193 : vector<2x32xf32>
    %219 = arith.addf %217, %218 : vector<2x32xf32>
    %220 = vector.shape_cast %219 : vector<2x32xf32> to vector<1x2x32xf32>
    %c7_76 = arith.constant 7 : index
    %c0_77 = arith.constant 0 : index
    %c0_78 = arith.constant 0 : index
    %221 = vector.load %arg12[%c7_76, %c0_77, %c0_78] : memref<8x2x32xf32, #tpu.memory_space<vmem>>, vector<1x2x32xf32>
    tpu.vector_store %arg12[%c7_76, %c0_77, %c0_78], %220 {strides = array<i32>} : memref<8x2x32xf32, #tpu.memory_space<vmem>>, vector<1x2x32xf32>,
    %c0_79 = arith.constant 0 : index
    %c0_80 = arith.constant 0 : index
    %222 = vector.load %arg6[%c0_79, %c0_80] : memref<32x96xf32, #tpu.memory_space<vmem>>, vector<32x96xf32>
    %c0_81 = arith.constant 0 : index
    %c0_82 = arith.constant 0 : index
    %223 = vector.load %arg7[%c0_81, %c0_82] : memref<32x96xf32, #tpu.memory_space<vmem>>, vector<32x96xf32>
    %c0_83 = arith.constant 0 : index
    %c0_84 = arith.constant 0 : index
    %224 = vector.load %arg8[%c0_83, %c0_84] : memref<1x96xf32, #tpu.memory_space<vmem>>, vector<1x96xf32>
    %c0_85 = arith.constant 0 : index
    %c0_86 = arith.constant 0 : index
    %225 = vector.load %arg9[%c0_85, %c0_86] : memref<1x32xf32, #tpu.memory_space<vmem>>, vector<1x32xf32>
    %226 = vector.shape_cast %225 : vector<1x32xf32> to vector<1x32xf32>
    %227 = vector.broadcast %226 : vector<1x32xf32> to vector<2x32xf32>
    %cst_87 = arith.constant 0.000000e+00 : f32
    %228 = vector.broadcast %cst_87 : f32 to vector<2x32xf32>
    %c0_88 = arith.constant 0 : index
    %c0_89 = arith.constant 0 : index
    %c0_90 = arith.constant 0 : index
    %229 = vector.load %arg12[%c0_88, %c0_89, %c0_90] : memref<8x2x32xf32, #tpu.memory_space<vmem>>, vector<8x2x32xf32>
    %230 = vector.shape_cast %229 : vector<8x2x32xf32> to vector<16x32xf32>
    %cst_91 = arith.constant dense<0.000000e+00> : vector<16x96xf32>
    %231 = tpu.matmul %230, %222, %cst_91 {dimension_numbers = #tpu.dot_dimension_numbers<[1], [0], [0], [1], [0, 0, 1, 1], [], []>} : vector<16x32xf32>, vector<32x96xf32>, vector<16x96xf32> -> vector<16x96xf32>
    %232 = vector.broadcast %224 : vector<1x96xf32> to vector<16x96xf32>
    %233 = arith.addf %231, %232 : vector<16x96xf32>
    %234 = vector.shape_cast %233 : vector<16x96xf32> to vector<8x2x96xf32>
    %c0_92 = arith.constant 0 : index
    %c0_93 = arith.constant 0 : index
    %c0_94 = arith.constant 0 : index
    %235 = vector.load %arg11[%c0_92, %c0_93, %c0_94] : memref<8x2x96xf32, #tpu.memory_space<vmem>>, vector<8x2x96xf32>
    tpu.vector_store %arg11[%c0_92, %c0_93, %c0_94], %234 {strides = array<i32>} : memref<8x2x96xf32, #tpu.memory_space<vmem>>, vector<8x2x96xf32>,
    %c0_95 = arith.constant 0 : index
    %c0_96 = arith.constant 0 : index
    %c0_97 = arith.constant 0 : index
    %236 = vector.load %arg11[%c0_95, %c0_96, %c0_97] : memref<8x2x96xf32, #tpu.memory_space<vmem>>, vector<1x2x96xf32>
    %237 = vector.shape_cast %236 : vector<1x2x96xf32> to vector<2x96xf32>
    %cst_98 = arith.constant dense<0.000000e+00> : vector<2x96xf32>
    %238 = tpu.matmul %228, %223, %cst_98 {dimension_numbers = #tpu.dot_dimension_numbers<[1], [0], [0], [1], [0, 0, 1, 1], [], []>} : vector<2x32xf32>, vector<32x96xf32>, vector<2x96xf32> -> vector<2x96xf32>
    %239 = vector.extract_strided_slice %237 {offsets = [0, 0], sizes = [2, 64], strides = [1, 1]} : vector<2x96xf32> to vector<2x64xf32>
    %240 = vector.extract_strided_slice %238 {offsets = [0, 0], sizes = [2, 64], strides = [1, 1]} : vector<2x96xf32> to vector<2x64xf32>
    %241 = arith.addf %239, %240 : vector<2x64xf32>
    %242 = arith.negf %241 : vector<2x64xf32>
    %243 = math.exp %242 : vector<2x64xf32>
    %cst_99 = arith.constant 1.000000e+00 : f32
    %244 = vector.broadcast %cst_99 : f32 to vector<2x64xf32>
    %245 = arith.addf %244, %243 : vector<2x64xf32>
    %246 = arith.divf %244, %245 : vector<2x64xf32>
    %247 = vector.extract_strided_slice %246 {offsets = [0, 0], sizes = [2, 32], strides = [1, 1]} : vector<2x64xf32> to vector<2x32xf32>
    %248 = vector.extract_strided_slice %246 {offsets = [0, 32], sizes = [2, 32], strides = [1, 1]} : vector<2x64xf32> to vector<2x32xf32>
    %249 = vector.extract_strided_slice %237 {offsets = [0, 64], sizes = [2, 32], strides = [1, 1]} : vector<2x96xf32> to vector<2x32xf32>
    %250 = vector.extract_strided_slice %238 {offsets = [0, 64], sizes = [2, 32], strides = [1, 1]} : vector<2x96xf32> to vector<2x32xf32>
    %251 = arith.addf %250, %227 : vector<2x32xf32>
    %252 = arith.mulf %247, %251 : vector<2x32xf32>
    %253 = arith.addf %249, %252 : vector<2x32xf32>
    %254 = math.tanh %253 : vector<2x32xf32>
    %cst_100 = arith.constant 1.000000e+00 : f32
    %255 = vector.broadcast %cst_100 : f32 to vector<2x32xf32>
    %256 = arith.subf %255, %248 : vector<2x32xf32>
    %257 = arith.mulf %256, %254 : vector<2x32xf32>
    %258 = arith.mulf %248, %228 : vector<2x32xf32>
    %259 = arith.addf %257, %258 : vector<2x32xf32>
    %260 = vector.shape_cast %259 : vector<2x32xf32> to vector<1x2x32xf32>
    %c0_101 = arith.constant 0 : index
    %c0_102 = arith.constant 0 : index
    %c0_103 = arith.constant 0 : index
    %261 = vector.load %arg10[%c0_101, %c0_102, %c0_103] : memref<8x2x32xf32, #tpu.memory_space<vmem>>, vector<1x2x32xf32>
    tpu.vector_store %arg10[%c0_101, %c0_102, %c0_103], %260 {strides = array<i32>} : memref<8x2x32xf32, #tpu.memory_space<vmem>>, vector<1x2x32xf32>,
    %c1_104 = arith.constant 1 : index
    %c0_105 = arith.constant 0 : index
    %c0_106 = arith.constant 0 : index
    %262 = vector.load %arg11[%c1_104, %c0_105, %c0_106] : memref<8x2x96xf32, #tpu.memory_space<vmem>>, vector<1x2x96xf32>
    %263 = vector.shape_cast %262 : vector<1x2x96xf32> to vector<2x96xf32>
    %cst_107 = arith.constant dense<0.000000e+00> : vector<2x96xf32>
    %264 = tpu.matmul %259, %223, %cst_107 {dimension_numbers = #tpu.dot_dimension_numbers<[1], [0], [0], [1], [0, 0, 1, 1], [], []>} : vector<2x32xf32>, vector<32x96xf32>, vector<2x96xf32> -> vector<2x96xf32>
    %265 = vector.extract_strided_slice %263 {offsets = [0, 0], sizes = [2, 64], strides = [1, 1]} : vector<2x96xf32> to vector<2x64xf32>
    %266 = vector.extract_strided_slice %264 {offsets = [0, 0], sizes = [2, 64], strides = [1, 1]} : vector<2x96xf32> to vector<2x64xf32>
    %267 = arith.addf %265, %266 : vector<2x64xf32>
    %268 = arith.negf %267 : vector<2x64xf32>
    %269 = math.exp %268 : vector<2x64xf32>
    %cst_108 = arith.constant 1.000000e+00 : f32
    %270 = vector.broadcast %cst_108 : f32 to vector<2x64xf32>
    %271 = arith.addf %270, %269 : vector<2x64xf32>
    %272 = arith.divf %270, %271 : vector<2x64xf32>
    %273 = vector.extract_strided_slice %272 {offsets = [0, 0], sizes = [2, 32], strides = [1, 1]} : vector<2x64xf32> to vector<2x32xf32>
    %274 = vector.extract_strided_slice %272 {offsets = [0, 32], sizes = [2, 32], strides = [1, 1]} : vector<2x64xf32> to vector<2x32xf32>
    %275 = vector.extract_strided_slice %263 {offsets = [0, 64], sizes = [2, 32], strides = [1, 1]} : vector<2x96xf32> to vector<2x32xf32>
    %276 = vector.extract_strided_slice %264 {offsets = [0, 64], sizes = [2, 32], strides = [1, 1]} : vector<2x96xf32> to vector<2x32xf32>
    %277 = arith.addf %276, %227 : vector<2x32xf32>
    %278 = arith.mulf %273, %277 : vector<2x32xf32>
    %279 = arith.addf %275, %278 : vector<2x32xf32>
    %280 = math.tanh %279 : vector<2x32xf32>
    %cst_109 = arith.constant 1.000000e+00 : f32
    %281 = vector.broadcast %cst_109 : f32 to vector<2x32xf32>
    %282 = arith.subf %281, %274 : vector<2x32xf32>
    %283 = arith.mulf %282, %280 : vector<2x32xf32>
    %284 = arith.mulf %274, %259 : vector<2x32xf32>
    %285 = arith.addf %283, %284 : vector<2x32xf32>
    %286 = vector.shape_cast %285 : vector<2x32xf32> to vector<1x2x32xf32>
    %c1_110 = arith.constant 1 : index
    %c0_111 = arith.constant 0 : index
    %c0_112 = arith.constant 0 : index
    %287 = vector.load %arg10[%c1_110, %c0_111, %c0_112] : memref<8x2x32xf32, #tpu.memory_space<vmem>>, vector<1x2x32xf32>
    tpu.vector_store %arg10[%c1_110, %c0_111, %c0_112], %286 {strides = array<i32>} : memref<8x2x32xf32, #tpu.memory_space<vmem>>, vector<1x2x32xf32>,
    %c2_113 = arith.constant 2 : index
    %c0_114 = arith.constant 0 : index
    %c0_115 = arith.constant 0 : index
    %288 = vector.load %arg11[%c2_113, %c0_114, %c0_115] : memref<8x2x96xf32, #tpu.memory_space<vmem>>, vector<1x2x96xf32>
    %289 = vector.shape_cast %288 : vector<1x2x96xf32> to vector<2x96xf32>
    %cst_116 = arith.constant dense<0.000000e+00> : vector<2x96xf32>
    %290 = tpu.matmul %285, %223, %cst_116 {dimension_numbers = #tpu.dot_dimension_numbers<[1], [0], [0], [1], [0, 0, 1, 1], [], []>} : vector<2x32xf32>, vector<32x96xf32>, vector<2x96xf32> -> vector<2x96xf32>
    %291 = vector.extract_strided_slice %289 {offsets = [0, 0], sizes = [2, 64], strides = [1, 1]} : vector<2x96xf32> to vector<2x64xf32>
    %292 = vector.extract_strided_slice %290 {offsets = [0, 0], sizes = [2, 64], strides = [1, 1]} : vector<2x96xf32> to vector<2x64xf32>
    %293 = arith.addf %291, %292 : vector<2x64xf32>
    %294 = arith.negf %293 : vector<2x64xf32>
    %295 = math.exp %294 : vector<2x64xf32>
    %cst_117 = arith.constant 1.000000e+00 : f32
    %296 = vector.broadcast %cst_117 : f32 to vector<2x64xf32>
    %297 = arith.addf %296, %295 : vector<2x64xf32>
    %298 = arith.divf %296, %297 : vector<2x64xf32>
    %299 = vector.extract_strided_slice %298 {offsets = [0, 0], sizes = [2, 32], strides = [1, 1]} : vector<2x64xf32> to vector<2x32xf32>
    %300 = vector.extract_strided_slice %298 {offsets = [0, 32], sizes = [2, 32], strides = [1, 1]} : vector<2x64xf32> to vector<2x32xf32>
    %301 = vector.extract_strided_slice %289 {offsets = [0, 64], sizes = [2, 32], strides = [1, 1]} : vector<2x96xf32> to vector<2x32xf32>
    %302 = vector.extract_strided_slice %290 {offsets = [0, 64], sizes = [2, 32], strides = [1, 1]} : vector<2x96xf32> to vector<2x32xf32>
    %303 = arith.addf %302, %227 : vector<2x32xf32>
    %304 = arith.mulf %299, %303 : vector<2x32xf32>
    %305 = arith.addf %301, %304 : vector<2x32xf32>
    %306 = math.tanh %305 : vector<2x32xf32>
    %cst_118 = arith.constant 1.000000e+00 : f32
    %307 = vector.broadcast %cst_118 : f32 to vector<2x32xf32>
    %308 = arith.subf %307, %300 : vector<2x32xf32>
    %309 = arith.mulf %308, %306 : vector<2x32xf32>
    %310 = arith.mulf %300, %285 : vector<2x32xf32>
    %311 = arith.addf %309, %310 : vector<2x32xf32>
    %312 = vector.shape_cast %311 : vector<2x32xf32> to vector<1x2x32xf32>
    %c2_119 = arith.constant 2 : index
    %c0_120 = arith.constant 0 : index
    %c0_121 = arith.constant 0 : index
    %313 = vector.load %arg10[%c2_119, %c0_120, %c0_121] : memref<8x2x32xf32, #tpu.memory_space<vmem>>, vector<1x2x32xf32>
    tpu.vector_store %arg10[%c2_119, %c0_120, %c0_121], %312 {strides = array<i32>} : memref<8x2x32xf32, #tpu.memory_space<vmem>>, vector<1x2x32xf32>,
    %c3_122 = arith.constant 3 : index
    %c0_123 = arith.constant 0 : index
    %c0_124 = arith.constant 0 : index
    %314 = vector.load %arg11[%c3_122, %c0_123, %c0_124] : memref<8x2x96xf32, #tpu.memory_space<vmem>>, vector<1x2x96xf32>
    %315 = vector.shape_cast %314 : vector<1x2x96xf32> to vector<2x96xf32>
    %cst_125 = arith.constant dense<0.000000e+00> : vector<2x96xf32>
    %316 = tpu.matmul %311, %223, %cst_125 {dimension_numbers = #tpu.dot_dimension_numbers<[1], [0], [0], [1], [0, 0, 1, 1], [], []>} : vector<2x32xf32>, vector<32x96xf32>, vector<2x96xf32> -> vector<2x96xf32>
    %317 = vector.extract_strided_slice %315 {offsets = [0, 0], sizes = [2, 64], strides = [1, 1]} : vector<2x96xf32> to vector<2x64xf32>
    %318 = vector.extract_strided_slice %316 {offsets = [0, 0], sizes = [2, 64], strides = [1, 1]} : vector<2x96xf32> to vector<2x64xf32>
    %319 = arith.addf %317, %318 : vector<2x64xf32>
    %320 = arith.negf %319 : vector<2x64xf32>
    %321 = math.exp %320 : vector<2x64xf32>
    %cst_126 = arith.constant 1.000000e+00 : f32
    %322 = vector.broadcast %cst_126 : f32 to vector<2x64xf32>
    %323 = arith.addf %322, %321 : vector<2x64xf32>
    %324 = arith.divf %322, %323 : vector<2x64xf32>
    %325 = vector.extract_strided_slice %324 {offsets = [0, 0], sizes = [2, 32], strides = [1, 1]} : vector<2x64xf32> to vector<2x32xf32>
    %326 = vector.extract_strided_slice %324 {offsets = [0, 32], sizes = [2, 32], strides = [1, 1]} : vector<2x64xf32> to vector<2x32xf32>
    %327 = vector.extract_strided_slice %315 {offsets = [0, 64], sizes = [2, 32], strides = [1, 1]} : vector<2x96xf32> to vector<2x32xf32>
    %328 = vector.extract_strided_slice %316 {offsets = [0, 64], sizes = [2, 32], strides = [1, 1]} : vector<2x96xf32> to vector<2x32xf32>
    %329 = arith.addf %328, %227 : vector<2x32xf32>
    %330 = arith.mulf %325, %329 : vector<2x32xf32>
    %331 = arith.addf %327, %330 : vector<2x32xf32>
    %332 = math.tanh %331 : vector<2x32xf32>
    %cst_127 = arith.constant 1.000000e+00 : f32
    %333 = vector.broadcast %cst_127 : f32 to vector<2x32xf32>
    %334 = arith.subf %333, %326 : vector<2x32xf32>
    %335 = arith.mulf %334, %332 : vector<2x32xf32>
    %336 = arith.mulf %326, %311 : vector<2x32xf32>
    %337 = arith.addf %335, %336 : vector<2x32xf32>
    %338 = vector.shape_cast %337 : vector<2x32xf32> to vector<1x2x32xf32>
    %c3_128 = arith.constant 3 : index
    %c0_129 = arith.constant 0 : index
    %c0_130 = arith.constant 0 : index
    %339 = vector.load %arg10[%c3_128, %c0_129, %c0_130] : memref<8x2x32xf32, #tpu.memory_space<vmem>>, vector<1x2x32xf32>
    tpu.vector_store %arg10[%c3_128, %c0_129, %c0_130], %338 {strides = array<i32>} : memref<8x2x32xf32, #tpu.memory_space<vmem>>, vector<1x2x32xf32>,
    %c4_131 = arith.constant 4 : index
    %c0_132 = arith.constant 0 : index
    %c0_133 = arith.constant 0 : index
    %340 = vector.load %arg11[%c4_131, %c0_132, %c0_133] : memref<8x2x96xf32, #tpu.memory_space<vmem>>, vector<1x2x96xf32>
    %341 = vector.shape_cast %340 : vector<1x2x96xf32> to vector<2x96xf32>
    %cst_134 = arith.constant dense<0.000000e+00> : vector<2x96xf32>
    %342 = tpu.matmul %337, %223, %cst_134 {dimension_numbers = #tpu.dot_dimension_numbers<[1], [0], [0], [1], [0, 0, 1, 1], [], []>} : vector<2x32xf32>, vector<32x96xf32>, vector<2x96xf32> -> vector<2x96xf32>
    %343 = vector.extract_strided_slice %341 {offsets = [0, 0], sizes = [2, 64], strides = [1, 1]} : vector<2x96xf32> to vector<2x64xf32>
    %344 = vector.extract_strided_slice %342 {offsets = [0, 0], sizes = [2, 64], strides = [1, 1]} : vector<2x96xf32> to vector<2x64xf32>
    %345 = arith.addf %343, %344 : vector<2x64xf32>
    %346 = arith.negf %345 : vector<2x64xf32>
    %347 = math.exp %346 : vector<2x64xf32>
    %cst_135 = arith.constant 1.000000e+00 : f32
    %348 = vector.broadcast %cst_135 : f32 to vector<2x64xf32>
    %349 = arith.addf %348, %347 : vector<2x64xf32>
    %350 = arith.divf %348, %349 : vector<2x64xf32>
    %351 = vector.extract_strided_slice %350 {offsets = [0, 0], sizes = [2, 32], strides = [1, 1]} : vector<2x64xf32> to vector<2x32xf32>
    %352 = vector.extract_strided_slice %350 {offsets = [0, 32], sizes = [2, 32], strides = [1, 1]} : vector<2x64xf32> to vector<2x32xf32>
    %353 = vector.extract_strided_slice %341 {offsets = [0, 64], sizes = [2, 32], strides = [1, 1]} : vector<2x96xf32> to vector<2x32xf32>
    %354 = vector.extract_strided_slice %342 {offsets = [0, 64], sizes = [2, 32], strides = [1, 1]} : vector<2x96xf32> to vector<2x32xf32>
    %355 = arith.addf %354, %227 : vector<2x32xf32>
    %356 = arith.mulf %351, %355 : vector<2x32xf32>
    %357 = arith.addf %353, %356 : vector<2x32xf32>
    %358 = math.tanh %357 : vector<2x32xf32>
    %cst_136 = arith.constant 1.000000e+00 : f32
    %359 = vector.broadcast %cst_136 : f32 to vector<2x32xf32>
    %360 = arith.subf %359, %352 : vector<2x32xf32>
    %361 = arith.mulf %360, %358 : vector<2x32xf32>
    %362 = arith.mulf %352, %337 : vector<2x32xf32>
    %363 = arith.addf %361, %362 : vector<2x32xf32>
    %364 = vector.shape_cast %363 : vector<2x32xf32> to vector<1x2x32xf32>
    %c4_137 = arith.constant 4 : index
    %c0_138 = arith.constant 0 : index
    %c0_139 = arith.constant 0 : index
    %365 = vector.load %arg10[%c4_137, %c0_138, %c0_139] : memref<8x2x32xf32, #tpu.memory_space<vmem>>, vector<1x2x32xf32>
    tpu.vector_store %arg10[%c4_137, %c0_138, %c0_139], %364 {strides = array<i32>} : memref<8x2x32xf32, #tpu.memory_space<vmem>>, vector<1x2x32xf32>,
    %c5_140 = arith.constant 5 : index
    %c0_141 = arith.constant 0 : index
    %c0_142 = arith.constant 0 : index
    %366 = vector.load %arg11[%c5_140, %c0_141, %c0_142] : memref<8x2x96xf32, #tpu.memory_space<vmem>>, vector<1x2x96xf32>
    %367 = vector.shape_cast %366 : vector<1x2x96xf32> to vector<2x96xf32>
    %cst_143 = arith.constant dense<0.000000e+00> : vector<2x96xf32>
    %368 = tpu.matmul %363, %223, %cst_143 {dimension_numbers = #tpu.dot_dimension_numbers<[1], [0], [0], [1], [0, 0, 1, 1], [], []>} : vector<2x32xf32>, vector<32x96xf32>, vector<2x96xf32> -> vector<2x96xf32>
    %369 = vector.extract_strided_slice %367 {offsets = [0, 0], sizes = [2, 64], strides = [1, 1]} : vector<2x96xf32> to vector<2x64xf32>
    %370 = vector.extract_strided_slice %368 {offsets = [0, 0], sizes = [2, 64], strides = [1, 1]} : vector<2x96xf32> to vector<2x64xf32>
    %371 = arith.addf %369, %370 : vector<2x64xf32>
    %372 = arith.negf %371 : vector<2x64xf32>
    %373 = math.exp %372 : vector<2x64xf32>
    %cst_144 = arith.constant 1.000000e+00 : f32
    %374 = vector.broadcast %cst_144 : f32 to vector<2x64xf32>
    %375 = arith.addf %374, %373 : vector<2x64xf32>
    %376 = arith.divf %374, %375 : vector<2x64xf32>
    %377 = vector.extract_strided_slice %376 {offsets = [0, 0], sizes = [2, 32], strides = [1, 1]} : vector<2x64xf32> to vector<2x32xf32>
    %378 = vector.extract_strided_slice %376 {offsets = [0, 32], sizes = [2, 32], strides = [1, 1]} : vector<2x64xf32> to vector<2x32xf32>
    %379 = vector.extract_strided_slice %367 {offsets = [0, 64], sizes = [2, 32], strides = [1, 1]} : vector<2x96xf32> to vector<2x32xf32>
    %380 = vector.extract_strided_slice %368 {offsets = [0, 64], sizes = [2, 32], strides = [1, 1]} : vector<2x96xf32> to vector<2x32xf32>
    %381 = arith.addf %380, %227 : vector<2x32xf32>
    %382 = arith.mulf %377, %381 : vector<2x32xf32>
    %383 = arith.addf %379, %382 : vector<2x32xf32>
    %384 = math.tanh %383 : vector<2x32xf32>
    %cst_145 = arith.constant 1.000000e+00 : f32
    %385 = vector.broadcast %cst_145 : f32 to vector<2x32xf32>
    %386 = arith.subf %385, %378 : vector<2x32xf32>
    %387 = arith.mulf %386, %384 : vector<2x32xf32>
    %388 = arith.mulf %378, %363 : vector<2x32xf32>
    %389 = arith.addf %387, %388 : vector<2x32xf32>
    %390 = vector.shape_cast %389 : vector<2x32xf32> to vector<1x2x32xf32>
    %c5_146 = arith.constant 5 : index
    %c0_147 = arith.constant 0 : index
    %c0_148 = arith.constant 0 : index
    %391 = vector.load %arg10[%c5_146, %c0_147, %c0_148] : memref<8x2x32xf32, #tpu.memory_space<vmem>>, vector<1x2x32xf32>
    tpu.vector_store %arg10[%c5_146, %c0_147, %c0_148], %390 {strides = array<i32>} : memref<8x2x32xf32, #tpu.memory_space<vmem>>, vector<1x2x32xf32>,
    %c6_149 = arith.constant 6 : index
    %c0_150 = arith.constant 0 : index
    %c0_151 = arith.constant 0 : index
    %392 = vector.load %arg11[%c6_149, %c0_150, %c0_151] : memref<8x2x96xf32, #tpu.memory_space<vmem>>, vector<1x2x96xf32>
    %393 = vector.shape_cast %392 : vector<1x2x96xf32> to vector<2x96xf32>
    %cst_152 = arith.constant dense<0.000000e+00> : vector<2x96xf32>
    %394 = tpu.matmul %389, %223, %cst_152 {dimension_numbers = #tpu.dot_dimension_numbers<[1], [0], [0], [1], [0, 0, 1, 1], [], []>} : vector<2x32xf32>, vector<32x96xf32>, vector<2x96xf32> -> vector<2x96xf32>
    %395 = vector.extract_strided_slice %393 {offsets = [0, 0], sizes = [2, 64], strides = [1, 1]} : vector<2x96xf32> to vector<2x64xf32>
    %396 = vector.extract_strided_slice %394 {offsets = [0, 0], sizes = [2, 64], strides = [1, 1]} : vector<2x96xf32> to vector<2x64xf32>
    %397 = arith.addf %395, %396 : vector<2x64xf32>
    %398 = arith.negf %397 : vector<2x64xf32>
    %399 = math.exp %398 : vector<2x64xf32>
    %cst_153 = arith.constant 1.000000e+00 : f32
    %400 = vector.broadcast %cst_153 : f32 to vector<2x64xf32>
    %401 = arith.addf %400, %399 : vector<2x64xf32>
    %402 = arith.divf %400, %401 : vector<2x64xf32>
    %403 = vector.extract_strided_slice %402 {offsets = [0, 0], sizes = [2, 32], strides = [1, 1]} : vector<2x64xf32> to vector<2x32xf32>
    %404 = vector.extract_strided_slice %402 {offsets = [0, 32], sizes = [2, 32], strides = [1, 1]} : vector<2x64xf32> to vector<2x32xf32>
    %405 = vector.extract_strided_slice %393 {offsets = [0, 64], sizes = [2, 32], strides = [1, 1]} : vector<2x96xf32> to vector<2x32xf32>
    %406 = vector.extract_strided_slice %394 {offsets = [0, 64], sizes = [2, 32], strides = [1, 1]} : vector<2x96xf32> to vector<2x32xf32>
    %407 = arith.addf %406, %227 : vector<2x32xf32>
    %408 = arith.mulf %403, %407 : vector<2x32xf32>
    %409 = arith.addf %405, %408 : vector<2x32xf32>
    %410 = math.tanh %409 : vector<2x32xf32>
    %cst_154 = arith.constant 1.000000e+00 : f32
    %411 = vector.broadcast %cst_154 : f32 to vector<2x32xf32>
    %412 = arith.subf %411, %404 : vector<2x32xf32>
    %413 = arith.mulf %412, %410 : vector<2x32xf32>
    %414 = arith.mulf %404, %389 : vector<2x32xf32>
    %415 = arith.addf %413, %414 : vector<2x32xf32>
    %416 = vector.shape_cast %415 : vector<2x32xf32> to vector<1x2x32xf32>
    %c6_155 = arith.constant 6 : index
    %c0_156 = arith.constant 0 : index
    %c0_157 = arith.constant 0 : index
    %417 = vector.load %arg10[%c6_155, %c0_156, %c0_157] : memref<8x2x32xf32, #tpu.memory_space<vmem>>, vector<1x2x32xf32>
    tpu.vector_store %arg10[%c6_155, %c0_156, %c0_157], %416 {strides = array<i32>} : memref<8x2x32xf32, #tpu.memory_space<vmem>>, vector<1x2x32xf32>,
    %c7_158 = arith.constant 7 : index
    %c0_159 = arith.constant 0 : index
    %c0_160 = arith.constant 0 : index
    %418 = vector.load %arg11[%c7_158, %c0_159, %c0_160] : memref<8x2x96xf32, #tpu.memory_space<vmem>>, vector<1x2x96xf32>
    %419 = vector.shape_cast %418 : vector<1x2x96xf32> to vector<2x96xf32>
    %cst_161 = arith.constant dense<0.000000e+00> : vector<2x96xf32>
    %420 = tpu.matmul %415, %223, %cst_161 {dimension_numbers = #tpu.dot_dimension_numbers<[1], [0], [0], [1], [0, 0, 1, 1], [], []>} : vector<2x32xf32>, vector<32x96xf32>, vector<2x96xf32> -> vector<2x96xf32>
    %421 = vector.extract_strided_slice %419 {offsets = [0, 0], sizes = [2, 64], strides = [1, 1]} : vector<2x96xf32> to vector<2x64xf32>
    %422 = vector.extract_strided_slice %420 {offsets = [0, 0], sizes = [2, 64], strides = [1, 1]} : vector<2x96xf32> to vector<2x64xf32>
    %423 = arith.addf %421, %422 : vector<2x64xf32>
    %424 = arith.negf %423 : vector<2x64xf32>
    %425 = math.exp %424 : vector<2x64xf32>
    %cst_162 = arith.constant 1.000000e+00 : f32
    %426 = vector.broadcast %cst_162 : f32 to vector<2x64xf32>
    %427 = arith.addf %426, %425 : vector<2x64xf32>
    %428 = arith.divf %426, %427 : vector<2x64xf32>
    %429 = vector.extract_strided_slice %428 {offsets = [0, 0], sizes = [2, 32], strides = [1, 1]} : vector<2x64xf32> to vector<2x32xf32>
    %430 = vector.extract_strided_slice %428 {offsets = [0, 32], sizes = [2, 32], strides = [1, 1]} : vector<2x64xf32> to vector<2x32xf32>
    %431 = vector.extract_strided_slice %419 {offsets = [0, 64], sizes = [2, 32], strides = [1, 1]} : vector<2x96xf32> to vector<2x32xf32>
    %432 = vector.extract_strided_slice %420 {offsets = [0, 64], sizes = [2, 32], strides = [1, 1]} : vector<2x96xf32> to vector<2x32xf32>
    %433 = arith.addf %432, %227 : vector<2x32xf32>
    %434 = arith.mulf %429, %433 : vector<2x32xf32>
    %435 = arith.addf %431, %434 : vector<2x32xf32>
    %436 = math.tanh %435 : vector<2x32xf32>
    %cst_163 = arith.constant 1.000000e+00 : f32
    %437 = vector.broadcast %cst_163 : f32 to vector<2x32xf32>
    %438 = arith.subf %437, %430 : vector<2x32xf32>
    %439 = arith.mulf %438, %436 : vector<2x32xf32>
    %440 = arith.mulf %430, %415 : vector<2x32xf32>
    %441 = arith.addf %439, %440 : vector<2x32xf32>
    %442 = vector.shape_cast %441 : vector<2x32xf32> to vector<1x2x32xf32>
    %c7_164 = arith.constant 7 : index
    %c0_165 = arith.constant 0 : index
    %c0_166 = arith.constant 0 : index
    %443 = vector.load %arg10[%c7_164, %c0_165, %c0_166] : memref<8x2x32xf32, #tpu.memory_space<vmem>>, vector<1x2x32xf32>
    tpu.vector_store %arg10[%c7_164, %c0_165, %c0_166], %442 {strides = array<i32>} : memref<8x2x32xf32, #tpu.memory_space<vmem>>, vector<1x2x32xf32>,
    return
  }
  func.func @transform_0(%arg0: i32) -> (i32, i32, i32) {
    %c0_i32 = arith.constant 0 : i32
    %c0_i32_0 = arith.constant 0 : i32
    %c0_i32_1 = arith.constant 0 : i32
    return %c0_i32, %arg0, %c0_i32_0 : i32, i32, i32
  }
  func.func @transform_1(%arg0: i32) -> (i32, i32) {
    %c0_i32 = arith.constant 0 : i32
    %c0_i32_0 = arith.constant 0 : i32
    %c0_i32_1 = arith.constant 0 : i32
    return %c0_i32, %c0_i32_0 : i32, i32
  }
  func.func @transform_2(%arg0: i32) -> (i32, i32) {
    %c0_i32 = arith.constant 0 : i32
    %c0_i32_0 = arith.constant 0 : i32
    %c0_i32_1 = arith.constant 0 : i32
    return %c0_i32, %c0_i32_0 : i32, i32
  }
  func.func @transform_3(%arg0: i32) -> (i32, i32) {
    %c0_i32 = arith.constant 0 : i32
    %c0_i32_0 = arith.constant 0 : i32
    %c0_i32_1 = arith.constant 0 : i32
    return %c0_i32, %c0_i32_0 : i32, i32
  }
  func.func @transform_4(%arg0: i32) -> (i32, i32) {
    %c0_i32 = arith.constant 0 : i32
    %c0_i32_0 = arith.constant 0 : i32
    %c0_i32_1 = arith.constant 0 : i32
    return %c0_i32, %c0_i32_0 : i32, i32
  }
  func.func @transform_5(%arg0: i32) -> (i32, i32) {
    %c0_i32 = arith.constant 0 : i32
    %c0_i32_0 = arith.constant 0 : i32
    %c0_i32_1 = arith.constant 0 : i32
    return %c0_i32, %c0_i32_0 : i32, i32
  }
  func.func @transform_6(%arg0: i32) -> (i32, i32) {
    %c0_i32 = arith.constant 0 : i32
    %c0_i32_0 = arith.constant 0 : i32
    %c0_i32_1 = arith.constant 0 : i32
    return %c0_i32, %c0_i32_0 : i32, i32
  }
  func.func @transform_7(%arg0: i32) -> (i32, i32) {
    %c0_i32 = arith.constant 0 : i32
    %c0_i32_0 = arith.constant 0 : i32
    %c0_i32_1 = arith.constant 0 : i32
    return %c0_i32, %c0_i32_0 : i32, i32
  }
  func.func @transform_8(%arg0: i32) -> (i32, i32) {
    %c0_i32 = arith.constant 0 : i32
    %c0_i32_0 = arith.constant 0 : i32
    %c0_i32_1 = arith.constant 0 : i32
    return %c0_i32, %c0_i32_0 : i32, i32
  }
  func.func @transform_9(%arg0: i32) -> (i32, i32, i32) {
    %c0_i32 = arith.constant 0 : i32
    %c0_i32_0 = arith.constant 0 : i32
    %c0_i32_1 = arith.constant 0 : i32
    return %c0_i32, %arg0, %c0_i32_0 : i32, i32, i32
  }
}

</mosaic_0001>

<bundles_post_ra>
// kernel: tpu_custom_call.1
= control target key start
LH: loop header
LB: loop body
LE: loop exit
PB: predicated region body
PF: predicated region fallthrough
CT: control target
= control target key end

     0   :  { %14 = vsyncpa [#allocation5], 0  ;;  %s3207_s0 = inlined_call_operand.vmem [shape: f32[8,2,4], index: 0, kind: input, shape index: {}]   ;;  %s3208_s1 = inlined_call_operand.vmem [shape: f32[4,96], index: 1, kind: input, shape index: {}]   ;;  %s3209_s2 = inlined_call_operand.hbm [shape: f32[32,96], index: 2, kind: input, shape index: {}]   ;;  %s3210_s3 = inlined_call_operand.vmem [shape: f32[1,96], index: 3, kind: input, shape index: {}]   ;;  %s3211_s4 = inlined_call_operand.vmem [shape: f32[1,32], index: 4, kind: input, shape index: {}]   ;;  %s3212_s5 = inlined_call_operand.vmem [shape: f32[32,96], index: 5, kind: input, shape index: {}]   ;;  %s3213_s6 = inlined_call_operand.hbm [shape: f32[32,96], index: 6, kind: input, shape index: {}]   ;;  %s3214_s7 = inlined_call_operand.vmem [shape: f32[1,96], index: 7, kind: input, shape index: {}]   ;;  %s3215_s8 = inlined_call_operand.vmem [shape: f32[1,32], index: 8, kind: input, shape index: {}]   ;;  %s3216_s9 = inlined_call_operand.hbm [shape: f32[8,2,32], index: 9, kind: output, shape index: {}]  }
   0x1   :  { %15 = vsyncpa [#allocation8], 0 }
   0x2   :  { %16 = vsyncpa [#allocation6], 0  ;;  %s2799_s30 = smov [#allocation4]   ;;  %s2727_s13 = scalar_lea.hbm %s3209_s2, 512 }
   0x3   :  { %s26_s10 = sshll.u32 %s2799_s30, 4  ;;  %p2728_p0 = scmp.ne.s32.totalorder %s3209_s2, %s2727_s13  ;;  %s27_s10 = int_to_ptr.vmem [resolvable:$true] %s26_s10 }
   0x4   :  { %p2731_p1 = scmp.lt.u32.totalorder %s2727_s13, %s3209_s2 }
   0x6   :  { %p2733_p2 = pnand %p2731_p1, %p2728_p0 }
   0x8   :  { %2736 = shalt.err (!%p2733_p2)
}
   0x9   :  { %s2737_s18 = scalar_lea.vmem %s27_s10, 512  ;;  %p2742_p4 = scmp.lt.s32.totalorder %s27_s10, %s27_s10 }
   0xa   :  { %p2738_p3 = scmp.ne.s32.totalorder %s27_s10, %s2737_s18  ;;  %p2743_p5 = scmp.lt.s32.totalorder %s2737_s18, %s2737_s18 }
   0xc   :  { %p2744_p6 = por %p2743_p5, %p2742_p4 }
   0xe   :  { %p2745_p7 = pnand %p2744_p6, %p2738_p3 }
  0x10   :  { %2748 = shalt.err (!%p2745_p7)
}
  0x11   :  { %s2800_s19 = smov 128   ;;  %s2801_s20 = smov 8  }
  0x12   :  { %32 = dma.hbm_to_vmem [thread:$0]  %s3209_s2, 512, %s27_s10, [#allocation5], %s2800_s19, %s2800_s19, %s2801_s20  }
  0x13   :  { %s2802_s23 = smov [#allocation7]   ;;  %s2749_s27 = scalar_lea.hbm %s3213_s6, 512 }
  0x14   :  { %s44_s24 = sshll.u32 %s2802_s23, 4  ;;  %p2750_p8 = scmp.ne.s32.totalorder %s3213_s6, %s2749_s27  ;;  %s45_s24 = int_to_ptr.vmem [resolvable:$true] %s44_s24 }
  0x15   :  { %p2753_p9 = scmp.lt.u32.totalorder %s2749_s27, %s3213_s6 }
  0x17   :  { %p2755_p10 = pnand %p2753_p9, %p2750_p8 }
  0x19   :  { %2758 = shalt.err (!%p2755_p10)
}
  0x1a   :  { %s2759_s12 = scalar_lea.vmem %s45_s24, 512  ;;  %p2764_p12 = scmp.lt.s32.totalorder %s45_s24, %s45_s24 }
  0x1b   :  { %p2760_p11 = scmp.ne.s32.totalorder %s45_s24, %s2759_s12  ;;  %p2765_p13 = scmp.lt.s32.totalorder %s2759_s12, %s2759_s12 }
  0x1d   :  { %p2766_p0 = por %p2765_p13, %p2764_p12 }
  0x1f   :  { %p2767_p1 = pnand %p2766_p0, %p2760_p11 }
  0x21   :  { %2770 = shalt.err (!%p2767_p1)
}
  0x22   :  { %50 = dma.hbm_to_vmem [thread:$0]  %s3213_s6, 512, %s45_s24, [#allocation8], %s2800_s19, %s2800_s19, %s2801_s20  }
  0x23   :  { %2793 = dma.done.wait [#allocation5], 512  }
  0x24   :  { %2794 = vsyncadd [#allocation5], 4294966784 }
  0x25   :  { %2795 = dma.done.wait [#allocation8], 512  }
  0x26   :  { %2796 = vsyncadd [#allocation8], 4294966784  ;;  %v100_v0 = vlaneseq  ;;  %v2803_v1 = vmov 0.0|0.0   ;;  %v2804_v2 = vmov 1983009808   ;;  %vm2805_vm0 = vmmov 0  }
  0x27   :  { %2514 = vmatprep.subr.bf16.mxu1 %v2803_v1  ;;  %v98_v3 = vunpack.c.l.s4 %v2804_v2  ;;  %v2806_v4 = vmov 0.0   ;;  %vm134_vm1 = vcmask 1043456   ;;  %v62_v7 = vld [vmem:[#allocation4] sm:$0xff]  ;;  %v63_v8 = vld [vmem:[#allocation4 + $0x8] sm:$0xff]  ;;  %v61_v9 = vld [vmem:[%s3208_s1] sm:$0xf] }
  0x28   :  { %2335 = vmatprep.mubr.msk.f32.mxu1 %vm2805_vm0, %v2806_v4  ;;  %v101_v6 = vshrl.u32 %v100_v0, 7  ;;  %v2894_v11 = vpack.c.bf16 %v63_v8, %v62_v7  ;;  %2322 = vmatprep.subr.msk.mxu0 %vm134_vm1, %v61_v9  ;;  %v73_v12 = vld [vmem:[%s3207_s0] sm:$0x3]  ;;  %v74_v13 = vld [vmem:[%s3207_s0 + $0x2] sm:$0x3]  ;;  %v65_v18 = vld [vmem:[#allocation4 + $0x18] sm:$0xff] }
  0x29   :  { %v99_v5 = vunpack.c.0.s8 %v98_v3  ;;  %v75_v14 = vld [vmem:[%s3207_s0 + $0x4] sm:$0x3]  ;;  %2323 = vmatpush3.msk.msra.mxu0 %vm134_vm1, %v61_v9  ;;  %v76_v15 = vld [vmem:[%s3207_s0 + $0x6] sm:$0x3]  ;;  %v95_v16 = vcombine.low %v73_v12, %v74_v13  ;;  %v77_v21 = vld [vmem:[%s3207_s0 + $0x8] sm:$0x3] }
  0x2a   :  { %v64_v17 = vld [vmem:[#allocation4 + $0x10] sm:$0xff]  ;;  %2516 = vmatpush3.bf16.msra.mxu1 %v2894_v11  ;;  %v96_v19 = vcombine.low %v75_v14, %v76_v15  ;;  %v78_v22 = vld [vmem:[%s3207_s0 + $0xa] sm:$0x3]  ;;  %v79_v23 = vld [vmem:[%s3207_s0 + $0xc] sm:$0x3]  ;;  %2520 = vmatprep.subr.bf16.mxu0 %v2803_v1  ;;  %s2807_s11 = smov 64  }
  0x2b   :  { %v2892_v10 = vsub.s32 %v99_v5, %v101_v6  ;;  %v2909_v20 = vpack.c.bf16 %v65_v18, %v64_v17  ;;  %2517 = vmatprep.subr.bf16.mxu1 %v2803_v1  ;;  %v80_v25 = vld [vmem:[%s3207_s0 + $0xe] sm:$0x3]  ;;  %v112_v26 = vcombine.low %v77_v21, %v78_v22  ;;  %v2194_v27 = vld [vmem:[%s3211_s4] ss:$0 sm:$0xff]  ;;  %vm129_vm2 = vcmask 31744  }
  0x2c   :  { %v113_v29 = vcombine.low %v79_v23, %v80_v25  ;;  %348 = vrot.lane.b32.xlu0 %v2194_v27, %s2807_s11  ;;  %v2195_v35 = vld [vmem:[%s3210_s3] ss:$0 sm:$0xff]  ;;  %vm257_vm3 = vcmask 779264   ;;  %s2808_s3 = smov 96   ;;  %vm375_vm4 = vcmask 254976   ;;  %vm267_vm5 = vcmask 261120  }
  0x2d   :  { %v103_v24 = vrot.slane %v95_v16, %v2892_v10  ;;  %v110_v28 = vrot.slane %v96_v19, %v2892_v10  ;;  %v120_v30 = vrot.slane %v112_v26, %v2892_v10 }
  0x2e   :  { %2519 = vmatpush3.bf16.msra.mxu1 %v2909_v20  ;;  %v127_v32 = vrot.slane %v113_v29, %v2892_v10 }
  0x2f   :  { %v111_v31 = vcombine.low %v103_v24, %v110_v28  ;;  %2526 = vmatprep.subr.bf16.mxu1 %v2803_v1 }
  0x30   :  { %v128_v33 = vcombine.low %v120_v30, %v127_v32 }
  0x31   :  { %2324 = vmatprep.mubr.msk.f32.mxu0 %vm129_vm2, %v111_v31  ;;  %2336 = vmatmul.mubr.f32.vlgmr.msra.gmra.mrb[0].mxu1 %v2806_v4 }
  0x32   :  { %2325 = vmatmul.mubr.msk.f32.vlgmr.msra.gmra.mrb[0].mxu0 %vm129_vm2, %v128_v33  ;;  %2528 = vmatpush3.bf16.msra.mxu1 %v2894_v11 }
  0x33   :  { %2522 = vmatpush3.bf16.msra.mxu0 %v2894_v11  ;;  %2346 = vmatprep.mubr.msk.f32.mxu0 %vm2805_vm0, %v2806_v4 }
  0x34   :  { %2523 = vmatprep.subr.bf16.mxu0 %v2803_v1  ;;  %2529 = vmatprep.subr.bf16.mxu1 %v2803_v1 }
  0x35   :  { %2357 = vmatprep.mubr.msk.f32.mxu1 %vm2805_vm0, %v2806_v4 }
  0x36   :  { %2531 = vmatpush3.bf16.msra.mxu1 %v2909_v20 }
  0x37   :  { %2525 = vmatpush3.bf16.msra.mxu0 %v2909_v20  ;;  %2538 = vmatprep.subr.bf16.mxu1 %v2803_v1 }
  0x38   :  { %2532 = vmatprep.subr.bf16.mxu0 %v2803_v1 }
  0x9e   :  { %v2948_v34 = vpop.permute.xlu0 %348 }
 0x104   :  { %v337_v36 = vpop.f32.mrb[0].mxu1 }
 0x105   :  { %v2326_v37 = vpop.f32.mrb[0].mxu0  ;;  %v351_v38 = vadd.f32 %v2948_v34, %v337_v36  ;;  %v2337_v39 = vpop.f32.mrb[1].mxu1 }
 0x106   :  { %v210_v40 = vadd.f32 %v2326_v37, %v2195_v35  ;;  %v204_v41 = vpop.f32.mrb[1].mxu0 }
 0x107   :  { %v205_v42 = vadd.f32 %v2195_v35, %v204_v41  ;;  %353 = vrot.lane.b32.xlu0 %v351_v38, %s2807_s11 }
 0x108   :  { %v232_v43 = vcombine.high %v210_v40, %v210_v40  ;;  %v239_v44 = vrot.slane %v210_v40, %v2892_v10 }
 0x109   :  { %v215_v45 = vcombine.high %v205_v42, %v205_v42  ;;  %v222_v46 = vrot.slane %v205_v42, %v2892_v10 }
 0x10a   :  { %v246_v47 = vrot.slane %v232_v43, %v2892_v10  ;;  %v247_v48 = vcombine.high %v239_v44, %v239_v44  ;;  %262 = vst.msk [vmem:[#allocation2 + $0x8] sm:$0x3] %vm257_vm3, %v239_v44 }
 0x10b   :  { %v229_v49 = vrot.slane %v215_v45, %v2892_v10  ;;  %v230_v50 = vcombine.high %v222_v46, %v222_v46  ;;  %258 = vst.msk [vmem:[#allocation2] sm:$0x3] %vm257_vm3, %v222_v46 }
 0x10c   :  { %v248_v51 = vcombine.high %v246_v47, %v246_v47  ;;  %263 = vst.msk [vmem:[#allocation2 + $0xa] sm:$0x3] %vm257_vm3, %v247_v48  ;;  %264 = vst.msk [vmem:[#allocation2 + $0xc] sm:$0x3] %vm257_vm3, %v246_v47 }
 0x10d   :  { %v231_v52 = vcombine.high %v229_v49, %v229_v49  ;;  %259 = vst.msk [vmem:[#allocation2 + $0x2] sm:$0x3] %vm257_vm3, %v230_v50  ;;  %260 = vst.msk [vmem:[#allocation2 + $0x4] sm:$0x3] %vm257_vm3, %v229_v49 }
 0x10e   :  { %265 = vst.msk [vmem:[#allocation2 + $0xe] sm:$0x3] %vm257_vm3, %v248_v51 }
 0x10f   :  { %261 = vst.msk [vmem:[#allocation2 + $0x6] sm:$0x3] %vm257_vm3, %v231_v52 }
 0x112   :  { %v266_v53 = vld [vmem:[#allocation2] sm:$0x3] }
 0x113   :  { %v341_v54 = vadd.f32 %v337_v36, %v266_v53 }
 0x114   :  { %v378_v13 = vld [vmem:[#allocation2 + $0x2] sm:$0x3]  ;;  %v485_v35 = vld [vmem:[#allocation2 + $0x4] sm:$0x3] }
 0x115   :  { %v2199_v55 = vmul.f32 -1.442695, %v341_v54 }
 0x117   :  { %2631 = vpow2.f32 %v2199_v55  ;;  %v592_v55 = vld [vmem:[#allocation2 + $0x6] sm:$0x3] }
 0x121   :  { %v2632_v56 = vpop.eup %2631 }
 0x122   :  { %v345_v57 = vadd.f32 1.0, %v2632_v56 }
 0x124   :  { %2633 = vrcp.f32 %v345_v57 }
 0x12e   :  { %v2634_v58 = vpop.eup %2633 }
 0x12f   :  { %v363_v0 = vsub.f32 1.0, %v2634_v58  ;;  %v369_v3 = vmul.f32 0.0, %v2634_v58 }
 0x179   :  { %v354_v59 = vpop.permute.xlu0 %353 }
 0x17a   :  { %v356_v60 = vmul.f32 %v2634_v58, %v354_v59 }
 0x17c   :  { %358 = vrot.lane.b32.xlu1 %v356_v60, %s2807_s11 }
 0x1ee   :  { %v359_v61 = vpop.permute.xlu1 %358 }
 0x1ef   :  { %v361_v62 = vadd.f32 %v359_v61, %v266_v53 }
 0x1f1   :  { %2635 = vtanh.f32 %v361_v62 }
 0x1fb   :  { %v2636_v63 = vpop.eup %2635 }
 0x1fc   :  { %365 = vrot.lane.b32.xlu1 %v2636_v63, %s2808_s3 }
 0x26e   :  { %v366_v2 = vpop.permute.xlu1 %365 }
 0x26f   :  { %v368_v5 = vmul.f32 %v366_v2, %v363_v0 }
 0x271   :  { %v370_v6 = vadd.f32 %v369_v3, %v368_v5 }
 0x273   :  { %372 = vrot.lane.b32.xlu0 %v370_v6, %s2808_s3 }
 0x2e5   :  { %v373_v7 = vpop.permute.xlu0 %372 }
 0x2e6   :  { %376 = vst.msk [vmem:[#allocation3] sm:$0x3] %vm375_vm4, %v373_v7  ;;  %2347 = vmatmul.mubr.msk.f32.vlgmr.msra.gmra.mrb[2].mxu0 %vm267_vm5, %v373_v7 }
 0x2e7   :  { %2534 = vmatpush3.bf16.msra.mxu0 %v2894_v11  ;;  %2368 = vmatprep.mubr.msk.f32.mxu0 %vm2805_vm0, %v2806_v4 }
 0x2e8   :  { %2535 = vmatprep.subr.bf16.mxu0 %v2803_v1 }
 0x2eb   :  { %2537 = vmatpush3.bf16.msra.mxu0 %v2909_v20 }
 0x2ec   :  { %2544 = vmatprep.subr.bf16.mxu0 %v2803_v1 }
 0x3b9   :  { %v447_v8 = vpop.f32.mrb[2].mxu0 }
 0x3ba   :  { %v458_v9 = vadd.f32 %v447_v8, %v2948_v34  ;;  %v2348_v12 = vpop.f32.mrb[3].mxu0  ;;  %v451_v14 = vadd.f32 %v447_v8, %v378_v13 }
 0x3bc   :  { %460 = vrot.lane.b32.xlu1 %v458_v9, %s2807_s11  ;;  %v2201_v15 = vmul.f32 -1.442695, %v451_v14 }
 0x3be   :  { %2637 = vpow2.f32 %v2201_v15  ;;  %v699_v15 = vld [vmem:[#allocation2 + $0x8] sm:$0x3] }
 0x3c8   :  { %v2638_v16 = vpop.eup %2637 }
 0x3c9   :  { %v455_v17 = vadd.f32 1.0, %v2638_v16 }
 0x3cb   :  { %2639 = vrcp.f32 %v455_v17 }
 0x3d5   :  { %v2640_v18 = vpop.eup %2639 }
 0x3d6   :  { %v470_v25 = vsub.f32 1.0, %v2640_v18  ;;  %v476_v27 = vmul.f32 %v2640_v18, %v370_v6 }
 0x42e   :  { %v461_v19 = vpop.permute.xlu1 %460 }
 0x42f   :  { %v463_v21 = vmul.f32 %v2640_v18, %v461_v19 }
 0x431   :  { %465 = vrot.lane.b32.xlu0 %v463_v21, %s2807_s11 }
 0x4a3   :  { %v466_v22 = vpop.permute.xlu0 %465 }
 0x4a4   :  { %v468_v23 = vadd.f32 %v466_v22, %v378_v13 }
 0x4a6   :  { %2641 = vtanh.f32 %v468_v23 }
 0x4b0   :  { %v2642_v24 = vpop.eup %2641 }
 0x4b1   :  { %472 = vrot.lane.b32.xlu1 %v2642_v24, %s2808_s3 }
 0x523   :  { %v473_v26 = vpop.permute.xlu1 %472 }
 0x524   :  { %v475_v28 = vmul.f32 %v473_v26, %v470_v25 }
 0x526   :  { %v477_v29 = vadd.f32 %v476_v27, %v475_v28 }
 0x528   :  { %479 = vrot.lane.b32.xlu0 %v477_v29, %s2808_s3 }
 0x59a   :  { %v480_v30 = vpop.permute.xlu0 %479 }
 0x59b   :  { %483 = vst.msk [vmem:[#allocation3 + $0x2] sm:$0x3] %vm375_vm4, %v480_v30  ;;  %2358 = vmatmul.mubr.msk.f32.vlgmr.msra.gmra.mrb[2].mxu1 %vm267_vm5, %v480_v30 }
 0x59c   :  { %2540 = vmatpush3.bf16.msra.mxu1 %v2894_v11  ;;  %2379 = vmatprep.mubr.msk.f32.mxu1 %vm2805_vm0, %v2806_v4 }
 0x59d   :  { %2541 = vmatprep.subr.bf16.mxu1 %v2803_v1 }
 0x5a0   :  { %2543 = vmatpush3.bf16.msra.mxu1 %v2909_v20 }
 0x5a1   :  { %2550 = vmatprep.subr.bf16.mxu1 %v2803_v1 }
 0x66e   :  { %v554_v31 = vpop.f32.mrb[2].mxu1 }
 0x66f   :  { %v565_v32 = vadd.f32 %v554_v31, %v2948_v34  ;;  %v2359_v33 = vpop.f32.mrb[3].mxu1  ;;  %v558_v36 = vadd.f32 %v554_v31, %v485_v35 }
 0x671   :  { %567 = vrot.lane.b32.xlu1 %v565_v32, %s2807_s11  ;;  %v2203_v37 = vmul.f32 -1.442695, %v558_v36 }
 0x673   :  { %2643 = vpow2.f32 %v2203_v37  ;;  %v806_v37 = vld [vmem:[#allocation2 + $0xa] sm:$0x3] }
 0x67d   :  { %v2644_v38 = vpop.eup %2643 }
 0x67e   :  { %v562_v39 = vadd.f32 1.0, %v2644_v38 }
 0x680   :  { %2645 = vrcp.f32 %v562_v39 }
 0x68a   :  { %v2646_v40 = vpop.eup %2645 }
 0x68b   :  { %v577_v46 = vsub.f32 1.0, %v2646_v40  ;;  %v583_v48 = vmul.f32 %v2646_v40, %v477_v29 }
 0x6e3   :  { %v568_v41 = vpop.permute.xlu1 %567 }
 0x6e4   :  { %v570_v42 = vmul.f32 %v2646_v40, %v568_v41 }
 0x6e6   :  { %572 = vrot.lane.b32.xlu0 %v570_v42, %s2807_s11 }
 0x758   :  { %v573_v43 = vpop.permute.xlu0 %572 }
 0x759   :  { %v575_v44 = vadd.f32 %v573_v43, %v485_v35 }
 0x75b   :  { %2647 = vtanh.f32 %v575_v44 }
 0x765   :  { %v2648_v45 = vpop.eup %2647 }
 0x766   :  { %579 = vrot.lane.b32.xlu1 %v2648_v45, %s2808_s3 }
 0x7d8   :  { %v580_v47 = vpop.permute.xlu1 %579 }
 0x7d9   :  { %v582_v49 = vmul.f32 %v580_v47, %v577_v46 }
 0x7db   :  { %v584_v50 = vadd.f32 %v583_v48, %v582_v49 }
 0x7dd   :  { %586 = vrot.lane.b32.xlu0 %v584_v50, %s2808_s3 }
 0x84f   :  { %v587_v51 = vpop.permute.xlu0 %586 }
 0x850   :  { %590 = vst.msk [vmem:[#allocation3 + $0x4] sm:$0x3] %vm375_vm4, %v587_v51  ;;  %2369 = vmatmul.mubr.msk.f32.vlgmr.msra.gmra.mrb[4].mxu0 %vm267_vm5, %v587_v51 }
 0x851   :  { %2546 = vmatpush3.bf16.msra.mxu0 %v2894_v11  ;;  %2390 = vmatprep.mubr.msk.f32.mxu0 %vm2805_vm0, %v2806_v4 }
 0x852   :  { %2547 = vmatprep.subr.bf16.mxu0 %v2803_v1 }
 0x855   :  { %2549 = vmatpush3.bf16.msra.mxu0 %v2909_v20 }
 0x856   :  { %2556 = vmatprep.subr.bf16.mxu0 %v2803_v1 }
 0x923   :  { %v661_v52 = vpop.f32.mrb[4].mxu0 }
 0x924   :  { %v672_v53 = vadd.f32 %v661_v52, %v2948_v34  ;;  %v2370_v54 = vpop.f32.mrb[5].mxu0  ;;  %v665_v56 = vadd.f32 %v661_v52, %v592_v55  ;;  %v1142_v52 = vld [vmem:[#allocation3 + $0x2] sm:$0x3] }
 0x926   :  { %674 = vrot.lane.b32.xlu1 %v672_v53, %s2807_s11  ;;  %v2205_v57 = vmul.f32 -1.442695, %v665_v56  ;;  %v1143_v53 = vld [vmem:[#allocation3 + $0x4] sm:$0x3] }
 0x928   :  { %2649 = vpow2.f32 %v2205_v57 }
 0x932   :  { %v2650_v58 = vpop.eup %2649 }
 0x933   :  { %v669_v59 = vadd.f32 1.0, %v2650_v58 }
 0x935   :  { %2651 = vrcp.f32 %v669_v59 }
 0x93f   :  { %v2652_v60 = vpop.eup %2651 }
 0x940   :  { %v684_v3 = vsub.f32 1.0, %v2652_v60  ;;  %v690_v6 = vmul.f32 %v2652_v60, %v584_v50 }
 0x998   :  { %v675_v61 = vpop.permute.xlu1 %674 }
 0x999   :  { %v677_v62 = vmul.f32 %v2652_v60, %v675_v61 }
 0x99b   :  { %679 = vrot.lane.b32.xlu0 %v677_v62, %s2807_s11 }
 0xa0d   :  { %v680_v63 = vpop.permute.xlu0 %679 }
 0xa0e   :  { %v682_v0 = vadd.f32 %v680_v63, %v592_v55  ;;  %v1141_v55 = vld [vmem:[#allocation3] sm:$0x3] }
 0xa0f   :  { %v1163_v56 = vcombine.low %v1141_v55, %v1142_v52 }
 0xa10   :  { %2653 = vtanh.f32 %v682_v0  ;;  %v913_v0 = vld [vmem:[#allocation2 + $0xc] sm:$0x3] }
 0xa11   :  { %v1171_v58 = vrot.slane %v1163_v56, %v2892_v10 }
 0xa1a   :  { %v2654_v2 = vpop.eup %2653 }
 0xa1b   :  { %686 = vrot.lane.b32.xlu1 %v2654_v2, %s2808_s3 }
 0xa8d   :  { %v687_v5 = vpop.permute.xlu1 %686 }
 0xa8e   :  { %v689_v7 = vmul.f32 %v687_v5, %v684_v3 }
 0xa90   :  { %v691_v8 = vadd.f32 %v690_v6, %v689_v7 }
 0xa92   :  { %693 = vrot.lane.b32.xlu0 %v691_v8, %s2808_s3 }
 0xb04   :  { %v694_v9 = vpop.permute.xlu0 %693 }
 0xb05   :  { %697 = vst.msk [vmem:[#allocation3 + $0x6] sm:$0x3] %vm375_vm4, %v694_v9  ;;  %2380 = vmatmul.mubr.msk.f32.vlgmr.msra.gmra.mrb[4].mxu1 %vm267_vm5, %v694_v9 }
 0xb06   :  { %2552 = vmatpush3.bf16.msra.mxu1 %v2894_v11  ;;  %2401 = vmatprep.mubr.msk.f32.mxu1 %vm2805_vm0, %v2806_v4 }
 0xb07   :  { %2553 = vmatprep.subr.bf16.mxu1 %v2803_v1 }
 0xb0a   :  { %2555 = vmatpush3.bf16.msra.mxu1 %v2909_v20 }
 0xb0c   :  { %v1144_v51 = vld [vmem:[#allocation3 + $0x6] sm:$0x3] }
 0xb0d   :  { %v1164_v54 = vcombine.low %v1143_v53, %v1144_v51  ;;  %v2214_v51 = vld [vmem:[%s3215_s8] ss:$0 sm:$0xff] }
 0xb0f   :  { %v1178_v57 = vrot.slane %v1164_v54, %v2892_v10 }
 0xb11   :  { %v1179_v60 = vcombine.low %v1171_v58, %v1178_v57 }
 0xbd8   :  { %v768_v12 = vpop.f32.mrb[4].mxu1 }
 0xbd9   :  { %v779_v13 = vadd.f32 %v768_v12, %v2948_v34  ;;  %v2381_v14 = vpop.f32.mrb[5].mxu1  ;;  %v772_v16 = vadd.f32 %v768_v12, %v699_v15 }
 0xbdb   :  { %781 = vrot.lane.b32.xlu1 %v779_v13, %s2807_s11  ;;  %v2207_v17 = vmul.f32 -1.442695, %v772_v16 }
 0xbdd   :  { %2655 = vpow2.f32 %v2207_v17 }
 0xbe7   :  { %v2656_v18 = vpop.eup %2655 }
 0xbe8   :  { %v776_v19 = vadd.f32 1.0, %v2656_v18 }
 0xbea   :  { %2657 = vrcp.f32 %v776_v19 }
 0xbf4   :  { %v2658_v21 = vpop.eup %2657 }
 0xbf5   :  { %v791_v27 = vsub.f32 1.0, %v2658_v21  ;;  %v797_v29 = vmul.f32 %v2658_v21, %v691_v8 }
 0xc4d   :  { %v782_v22 = vpop.permute.xlu1 %781 }
 0xc4e   :  { %v784_v23 = vmul.f32 %v2658_v21, %v782_v22 }
 0xc50   :  { %786 = vrot.lane.b32.xlu0 %v784_v23, %s2807_s11 }
 0xcc2   :  { %v787_v24 = vpop.permute.xlu0 %786 }
 0xcc3   :  { %v789_v25 = vadd.f32 %v787_v24, %v699_v15 }
 0xcc5   :  { %2659 = vtanh.f32 %v789_v25  ;;  %v1020_v25 = vld [vmem:[#allocation2 + $0xe] sm:$0x3] }
 0xccf   :  { %v2660_v26 = vpop.eup %2659 }
 0xcd0   :  { %793 = vrot.lane.b32.xlu1 %v2660_v26, %s2808_s3 }
 0xd42   :  { %v794_v28 = vpop.permute.xlu1 %793 }
 0xd43   :  { %v796_v30 = vmul.f32 %v794_v28, %v791_v27 }
 0xd45   :  { %v798_v31 = vadd.f32 %v797_v29, %v796_v30 }
 0xd47   :  { %800 = vrot.lane.b32.xlu0 %v798_v31, %s2808_s3 }
 0xdb9   :  { %v801_v32 = vpop.permute.xlu0 %800 }
 0xdba   :  { %804 = vst.msk [vmem:[#allocation3 + $0x8] sm:$0x3] %vm375_vm4, %v801_v32  ;;  %2391 = vmatmul.mubr.msk.f32.vlgmr.msra.gmra.mrb[6].mxu0 %vm267_vm5, %v801_v32 }
 0xdbb   :  { %2558 = vmatpush3.bf16.msra.mxu0 %v2894_v11  ;;  %2412 = vmatprep.mubr.msk.f32.mxu0 %vm2805_vm0, %v2806_v4 }
 0xdbc   :  { %2559 = vmatprep.subr.bf16.mxu0 %v2803_v1 }
 0xdbf   :  { %2561 = vmatpush3.bf16.msra.mxu0 %v2909_v20 }
 0xdc0   :  { %2570 = vmatprep.subr.bf16.mxu0 %v2803_v1 }
 0xdc1   :  { %v1145_v58 = vld [vmem:[#allocation3 + $0x8] sm:$0x3] }
 0xe8d   :  { %v875_v33 = vpop.f32.mrb[6].mxu0 }
 0xe8e   :  { %v886_v35 = vadd.f32 %v875_v33, %v2948_v34  ;;  %v2392_v36 = vpop.f32.mrb[7].mxu0  ;;  %v879_v38 = vadd.f32 %v875_v33, %v806_v37 }
 0xe8f   :  { %v1130_v36 = vld [vmem:[#allocation7] sm:$0xff] }
 0xe90   :  { %888 = vrot.lane.b32.xlu1 %v886_v35, %s2807_s11  ;;  %v2209_v39 = vmul.f32 -1.442695, %v879_v38 }
 0xe92   :  { %2661 = vpow2.f32 %v2209_v39  ;;  %v1133_v39 = vld [vmem:[#allocation7 + $0x18] sm:$0xff] }
 0xe9c   :  { %v2662_v11 = vpop.eup %2661 }
 0xe9d   :  { %v883_v40 = vadd.f32 1.0, %v2662_v11 }
 0xe9f   :  { %2663 = vrcp.f32 %v883_v40 }
 0xea9   :  { %v2664_v41 = vpop.eup %2663 }
 0xeaa   :  { %v898_v46 = vsub.f32 1.0, %v2664_v41  ;;  %v904_v48 = vmul.f32 %v2664_v41, %v798_v31 }
 0xf02   :  { %v889_v42 = vpop.permute.xlu1 %888 }
 0xf03   :  { %v891_v43 = vmul.f32 %v2664_v41, %v889_v42  ;;  %v1126_v41 = vld [vmem:[%s3212_s5] sm:$0xff]  ;;  %v1127_v42 = vld [vmem:[%s3212_s5 + $0x8] sm:$0xff] }
 0xf05   :  { %893 = vrot.lane.b32.xlu0 %v891_v43, %s2807_s11  ;;  %v1128_v43 = vld [vmem:[%s3212_s5 + $0x10] sm:$0xff] }
 0xf77   :  { %v894_v20 = vpop.permute.xlu0 %893 }
 0xf78   :  { %v896_v44 = vadd.f32 %v894_v20, %v806_v37  ;;  %v1132_v37 = vld [vmem:[#allocation7 + $0x10] sm:$0xff]  ;;  %v2562_v20 = vpack.c.bf16 %v1127_v42, %v1126_v41 }
 0xf79   :  { %v3054_v11 = vpack.c.bf16 %v1133_v39, %v1132_v37 }
 0xf7a   :  { %2665 = vtanh.f32 %v896_v44  ;;  %v1129_v44 = vld [vmem:[%s3212_s5 + $0x18] sm:$0xff]  ;;  %2563 = vmatprep.subr.bf16.mxu1 %v2562_v20 }
 0xf84   :  { %v2666_v45 = vpop.eup %2665 }
 0xf85   :  { %900 = vrot.lane.b32.xlu1 %v2666_v45, %s2808_s3  ;;  %v2566_v45 = vpack.c.bf16 %v1129_v44, %v1128_v43 }
 0xff7   :  { %v901_v47 = vpop.permute.xlu1 %900 }
 0xff8   :  { %v903_v49 = vmul.f32 %v901_v47, %v898_v46 }
 0xffa   :  { %v905_v50 = vadd.f32 %v904_v48, %v903_v49 }
 0xffc   :  { %907 = vrot.lane.b32.xlu0 %v905_v50, %s2808_s3 }
0x106e   :  { %v908_v59 = vpop.permute.xlu0 %907 }
0x106f   :  { %911 = vst.msk [vmem:[#allocation3 + $0xa] sm:$0x3] %vm375_vm4, %v908_v59  ;;  %2402 = vmatmul.mubr.msk.f32.vlgmr.msra.gmra.mrb[6].mxu1 %vm267_vm5, %v908_v59 }
0x1070   :  { %2423 = vmatprep.mubr.msk.f32.mxu1 %vm267_vm5, %v1179_v60  ;;  %2565 = vmatpush3.bf16.msra.mxu1 %v2562_v20 }
0x1071   :  { %2567 = vmatprep.subr.bf16.mxu1 %v2566_v45 }
0x1074   :  { %2569 = vmatpush3.bf16.msra.mxu1 %v2566_v45 }
0x1075   :  { %2576 = vmatprep.subr.bf16.mxu1 %v2803_v1 }
0x1076   :  { %v1146_v57 = vld [vmem:[#allocation3 + $0xa] sm:$0x3] }
0x1077   :  { %v1180_v59 = vcombine.low %v1145_v58, %v1146_v57 }
0x1142   :  { %v982_v61 = vpop.f32.mrb[6].mxu1 }
0x1143   :  { %v993_v62 = vadd.f32 %v982_v61, %v2948_v34  ;;  %v2403_v63 = vpop.f32.mrb[7].mxu1  ;;  %v986_v2 = vadd.f32 %v982_v61, %v913_v0 }
0x1144   :  { %v1188_v63 = vrot.slane %v1180_v59, %v2892_v10 }
0x1145   :  { %995 = vrot.lane.b32.xlu1 %v993_v62, %s2807_s11  ;;  %v2211_v3 = vmul.f32 -1.442695, %v986_v2 }
0x1147   :  { %2667 = vpow2.f32 %v2211_v3  ;;  %v2215_v3 = vld [vmem:[%s3214_s7] ss:$0 sm:$0xff]  ;;  %s2809_s7 = smov [#allocation9]  }
0x1148   :  { %s2181_s19 = sshll.u32 %s2809_s7, 4  ;;  %s2182_s19 = int_to_ptr.vmem [resolvable:$true] %s2181_s19 }
0x1149   :  { %s2771_s20 = scalar_lea.vmem %s2182_s19, 256  ;;  %p2776_p3 = scmp.lt.s32.totalorder %s2182_s19, %s2182_s19 }
0x114a   :  { %p2772_p2 = scmp.ne.s32.totalorder %s2182_s19, %s2771_s20  ;;  %p2777_p4 = scmp.lt.s32.totalorder %s2771_s20, %s2771_s20 }
0x114c   :  { %p2778_p5 = por %p2777_p4, %p2776_p3 }
0x114e   :  { %p2779_p6 = pnand %p2778_p5, %p2772_p2 }
0x1151   :  { %v2668_v5 = vpop.eup %2667 }
0x1152   :  { %v990_v6 = vadd.f32 1.0, %v2668_v5 }
0x1154   :  { %2669 = vrcp.f32 %v990_v6 }
0x115e   :  { %v2670_v7 = vpop.eup %2669 }
0x115f   :  { %v1005_v15 = vsub.f32 1.0, %v2670_v7  ;;  %v1011_v17 = vmul.f32 %v2670_v7, %v905_v50 }
0x11b7   :  { %v996_v8 = vpop.permute.xlu1 %995 }
0x11b8   :  { %v998_v9 = vmul.f32 %v2670_v7, %v996_v8 }
0x11ba   :  { %1000 = vrot.lane.b32.xlu0 %v998_v9, %s2807_s11 }
0x122c   :  { %v1001_v12 = vpop.permute.xlu0 %1000 }
0x122d   :  { %v1003_v13 = vadd.f32 %v1001_v12, %v913_v0 }
0x122f   :  { %2671 = vtanh.f32 %v1003_v13 }
0x1239   :  { %v2672_v14 = vpop.eup %2671 }
0x123a   :  { %1007 = vrot.lane.b32.xlu1 %v2672_v14, %s2808_s3 }
0x12ac   :  { %v1008_v16 = vpop.permute.xlu1 %1007 }
0x12ad   :  { %v1010_v18 = vmul.f32 %v1008_v16, %v1005_v15 }
0x12af   :  { %v1012_v19 = vadd.f32 %v1011_v17, %v1010_v18 }
0x12b1   :  { %1014 = vrot.lane.b32.xlu0 %v1012_v19, %s2808_s3 }
0x1323   :  { %v1015_v21 = vpop.permute.xlu0 %1014 }
0x1324   :  { %1018 = vst.msk [vmem:[#allocation3 + $0xc] sm:$0x3] %vm375_vm4, %v1015_v21  ;;  %2413 = vmatmul.mubr.msk.f32.vlgmr.msra.gmra.mrb[8].mxu0 %vm267_vm5, %v1015_v21 }
0x1325   :  { %2434 = vmatprep.mubr.msk.f32.mxu0 %vm2805_vm0, %v2806_v4 }
0x132b   :  { %v1147_v60 = vld [vmem:[#allocation3 + $0xc] sm:$0x3] }
0x13f7   :  { %v1089_v22 = vpop.f32.mrb[8].mxu0 }
0x13f8   :  { %v1100_v23 = vadd.f32 %v1089_v22, %v2948_v34  ;;  %v2414_v24 = vpop.f32.mrb[9].mxu0  ;;  %v1093_v26 = vadd.f32 %v1089_v22, %v1020_v25  ;;  %v1131_v34 = vld [vmem:[#allocation7 + $0x8] sm:$0xff] }
0x13f9   :  { %v3051_v38 = vpack.c.bf16 %v1131_v34, %v1130_v36 }
0x13fa   :  { %1102 = vrot.lane.b32.xlu1 %v1100_v23, %s2807_s11  ;;  %v2213_v27 = vmul.f32 -1.442695, %v1093_v26 }
0x13fb   :  { %2572 = vmatpush3.bf16.msra.mxu0 %v3051_v38 }
0x13fc   :  { %2673 = vpow2.f32 %v2213_v27  ;;  %2573 = vmatprep.subr.bf16.mxu0 %v2803_v1 }
0x13ff   :  { %2575 = vmatpush3.bf16.msra.mxu0 %v3054_v11 }
0x1400   :  { %2582 = vmatprep.subr.bf16.mxu0 %v2803_v1 }
0x1402   :  { %2435 = vmatmul.mubr.f32.vlgmr.msra.gmra.mrb[10].mxu0 %v2806_v4 }
0x1403   :  { %2584 = vmatpush3.bf16.msra.mxu0 %v3051_v38  ;;  %2456 = vmatprep.mubr.msk.f32.mxu0 %vm2805_vm0, %v2806_v4 }
0x1404   :  { %2585 = vmatprep.subr.bf16.mxu0 %v2803_v1 }
0x1406   :  { %v2674_v28 = vpop.eup %2673 }
0x1407   :  { %v1097_v29 = vadd.f32 1.0, %v2674_v28  ;;  %2587 = vmatpush3.bf16.msra.mxu0 %v3054_v11 }
0x1408   :  { %2594 = vmatprep.subr.bf16.mxu0 %v2803_v1 }
0x1409   :  { %2675 = vrcp.f32 %v1097_v29 }
0x1413   :  { %v2676_v30 = vpop.eup %2675 }
0x1414   :  { %v1112_v46 = vsub.f32 1.0, %v2676_v30  ;;  %v1118_v48 = vmul.f32 %v2676_v30, %v1012_v19 }
0x146c   :  { %v1103_v31 = vpop.permute.xlu1 %1102 }
0x146d   :  { %v1105_v32 = vmul.f32 %v2676_v30, %v1103_v31 }
0x146f   :  { %1107 = vrot.lane.b32.xlu0 %v1105_v32, %s2807_s11 }
0x14d5   :  { %v1395_v52 = vpop.f32.mrb[10].mxu0 }
0x14d6   :  { %v2436_v53 = vpop.f32.mrb[11].mxu0 }
0x14e1   :  { %v1108_v33 = vpop.permute.xlu0 %1107 }
0x14e2   :  { %v1110_v35 = vadd.f32 %v1108_v33, %v1020_v25 }
0x14e4   :  { %2677 = vtanh.f32 %v1110_v35 }
0x14ee   :  { %v2678_v40 = vpop.eup %2677 }
0x14ef   :  { %1114 = vrot.lane.b32.xlu1 %v2678_v40, %s2808_s3 }
0x14f3   :  { %1406 = vrot.lane.b32.xlu1 %v2214_v51, %s2807_s11 }
0x1561   :  { %v1115_v47 = vpop.permute.xlu1 %1114 }
0x1562   :  { %v1117_v49 = vmul.f32 %v1115_v47, %v1112_v46 }
0x1564   :  { %v1119_v50 = vadd.f32 %v1118_v48, %v1117_v49 }
0x1565   :  { %v3086_v55 = vpop.permute.xlu1 %1406 }
0x1566   :  { %1121 = vrot.lane.b32.xlu0 %v1119_v50, %s2808_s3  ;;  %v1409_v56 = vadd.f32 %v3086_v55, %v1395_v52 }
0x156a   :  { %1411 = vrot.lane.b32.xlu0 %v1409_v56, %s2807_s11 }
0x15d8   :  { %v1122_v54 = vpop.permute.xlu0 %1121 }
0x15d9   :  { %1125 = vst.msk [vmem:[#allocation3 + $0xe] sm:$0x3] %vm375_vm4, %v1122_v54 }
0x15dc   :  { %v1412_v26 = vpop.permute.xlu0 %1411 }
0x15e0   :  { %v1148_v61 = vld [vmem:[#allocation3 + $0xe] sm:$0x3] }
0x15e1   :  { %v1181_v62 = vcombine.low %v1147_v60, %v1148_v61 }
0x15e3   :  { %v1195_v0 = vrot.slane %v1181_v62, %v2892_v10 }
0x15e5   :  { %v1196_v2 = vcombine.low %v1188_v63, %v1195_v0 }
0x15e7   :  { %2424 = vmatmul.mubr.msk.f32.vlgmr.msra.gmra.mrb[8].mxu1 %vm267_vm5, %v1196_v2 }
0x15e8   :  { %2578 = vmatpush3.bf16.msra.mxu1 %v3051_v38  ;;  %2445 = vmatprep.mubr.msk.f32.mxu1 %vm2805_vm0, %v2806_v4 }
0x15e9   :  { %2579 = vmatprep.subr.bf16.mxu1 %v2803_v1 }
0x15ec   :  { %2581 = vmatpush3.bf16.msra.mxu1 %v3054_v11 }
0x15ed   :  { %2588 = vmatprep.subr.bf16.mxu1 %v2803_v1 }
0x16ba   :  { %v2425_v5 = vpop.f32.mrb[8].mxu1 }
0x16bb   :  { %v1273_v6 = vadd.f32 %v2425_v5, %v2215_v3  ;;  %v1267_v7 = vpop.f32.mrb[9].mxu1 }
0x16bc   :  { %v1268_v8 = vadd.f32 %v2215_v3, %v1267_v7 }
0x16bd   :  { %v1295_v9 = vcombine.high %v1273_v6, %v1273_v6  ;;  %v1302_v12 = vrot.slane %v1273_v6, %v2892_v10 }
0x16be   :  { %v1278_v13 = vcombine.high %v1268_v8, %v1268_v8  ;;  %v1285_v14 = vrot.slane %v1268_v8, %v2892_v10 }
0x16bf   :  { %v1309_v15 = vrot.slane %v1295_v9, %v2892_v10  ;;  %v1310_v16 = vcombine.high %v1302_v12, %v1302_v12  ;;  %1324 = vst.msk [vmem:[#allocation2 + $0x8] sm:$0x3] %vm257_vm3, %v1302_v12 }
0x16c0   :  { %v1292_v17 = vrot.slane %v1278_v13, %v2892_v10  ;;  %v1293_v18 = vcombine.high %v1285_v14, %v1285_v14  ;;  %1320 = vst.msk [vmem:[#allocation2] sm:$0x3] %vm257_vm3, %v1285_v14 }
0x16c1   :  { %v1311_v19 = vcombine.high %v1309_v15, %v1309_v15  ;;  %1325 = vst.msk [vmem:[#allocation2 + $0xa] sm:$0x3] %vm257_vm3, %v1310_v16  ;;  %1326 = vst.msk [vmem:[#allocation2 + $0xc] sm:$0x3] %vm257_vm3, %v1309_v15 }
0x16c2   :  { %v1294_v21 = vcombine.high %v1292_v17, %v1292_v17  ;;  %1321 = vst.msk [vmem:[#allocation2 + $0x2] sm:$0x3] %vm257_vm3, %v1293_v18  ;;  %1322 = vst.msk [vmem:[#allocation2 + $0x4] sm:$0x3] %vm257_vm3, %v1292_v17 }
0x16c3   :  { %1327 = vst.msk [vmem:[#allocation2 + $0xe] sm:$0x3] %vm257_vm3, %v1311_v19 }
0x16c4   :  { %1323 = vst.msk [vmem:[#allocation2 + $0x6] sm:$0x3] %vm257_vm3, %v1294_v21 }
0x16c7   :  { %v1328_v22 = vld [vmem:[#allocation2] sm:$0x3] }
0x16c8   :  { %v1399_v23 = vadd.f32 %v1395_v52, %v1328_v22 }
0x16c9   :  { %v1434_v42 = vld [vmem:[#allocation2 + $0x2] sm:$0x3]  ;;  %v1540_v62 = vld [vmem:[#allocation2 + $0x4] sm:$0x3] }
0x16ca   :  { %v2218_v10 = vmul.f32 -1.442695, %v1399_v23 }
0x16cb   :  { %v1646_v23 = vld [vmem:[#allocation2 + $0x6] sm:$0x3] }
0x16cc   :  { %2679 = vpow2.f32 %v2218_v10 }
0x16d6   :  { %v2680_v24 = vpop.eup %2679 }
0x16d7   :  { %v1403_v25 = vadd.f32 1.0, %v2680_v24 }
0x16d9   :  { %2681 = vrcp.f32 %v1403_v25 }
0x16e3   :  { %v2682_v27 = vpop.eup %2681 }
0x16e4   :  { %v1414_v28 = vmul.f32 %v2682_v27, %v1412_v26  ;;  %v1421_v32 = vsub.f32 1.0, %v2682_v27  ;;  %v1427_v35 = vmul.f32 0.0, %v2682_v27 }
0x16e6   :  { %1416 = vrot.lane.b32.xlu1 %v1414_v28, %s2807_s11 }
0x1758   :  { %v1417_v29 = vpop.permute.xlu1 %1416 }
0x1759   :  { %v1419_v30 = vadd.f32 %v1417_v29, %v1328_v22 }
0x175b   :  { %2683 = vtanh.f32 %v1419_v30 }
0x1765   :  { %v2684_v31 = vpop.eup %2683 }
0x1766   :  { %1423 = vrot.lane.b32.xlu0 %v2684_v31, %s2808_s3 }
0x17d8   :  { %v1424_v33 = vpop.permute.xlu0 %1423 }
0x17d9   :  { %v1426_v36 = vmul.f32 %v1424_v33, %v1421_v32 }
0x17db   :  { %v1428_v34 = vadd.f32 %v1427_v35, %v1426_v36 }
0x17dd   :  { %1430 = vrot.lane.b32.xlu1 %v1428_v34, %s2808_s3 }
0x184f   :  { %v1431_v37 = vpop.permute.xlu1 %1430 }
0x1850   :  { %1433 = vst.msk [vmem:[#allocation9] sm:$0x3] %vm375_vm4, %v1431_v37  ;;  %2446 = vmatmul.mubr.msk.f32.vlgmr.msra.gmra.mrb[10].mxu1 %vm267_vm5, %v1431_v37 }
0x1851   :  { %2590 = vmatpush3.bf16.msra.mxu1 %v3051_v38  ;;  %2467 = vmatprep.mubr.msk.f32.mxu1 %vm2805_vm0, %v2806_v4 }
0x1852   :  { %2591 = vmatprep.subr.bf16.mxu1 %v2803_v1 }
0x1855   :  { %2593 = vmatpush3.bf16.msra.mxu1 %v3054_v11 }
0x1856   :  { %2600 = vmatprep.subr.bf16.mxu1 %v2803_v1 }
0x1923   :  { %v1503_v39 = vpop.f32.mrb[10].mxu1 }
0x1924   :  { %v1514_v40 = vadd.f32 %v1503_v39, %v3086_v55  ;;  %v2447_v41 = vpop.f32.mrb[11].mxu1  ;;  %v1507_v43 = vadd.f32 %v1503_v39, %v1434_v42 }
0x1926   :  { %1516 = vrot.lane.b32.xlu0 %v1514_v40, %s2807_s11  ;;  %v2220_v20 = vmul.f32 -1.442695, %v1507_v43  ;;  %v1752_v43 = vld [vmem:[#allocation2 + $0x8] sm:$0x3] }
0x1928   :  { %2685 = vpow2.f32 %v2220_v20 }
0x1932   :  { %v2686_v44 = vpop.eup %2685 }
0x1933   :  { %v1511_v45 = vadd.f32 1.0, %v2686_v44 }
0x1935   :  { %2687 = vrcp.f32 %v1511_v45 }
0x193f   :  { %v2688_v46 = vpop.eup %2687 }
0x1940   :  { %v1526_v52 = vsub.f32 1.0, %v2688_v46  ;;  %v1532_v54 = vmul.f32 %v2688_v46, %v1428_v34 }
0x1998   :  { %v1517_v47 = vpop.permute.xlu0 %1516 }
0x1999   :  { %v1519_v48 = vmul.f32 %v2688_v46, %v1517_v47 }
0x199b   :  { %1521 = vrot.lane.b32.xlu1 %v1519_v48, %s2807_s11 }
0x1a0d   :  { %v1522_v49 = vpop.permute.xlu1 %1521 }
0x1a0e   :  { %v1524_v50 = vadd.f32 %v1522_v49, %v1434_v42 }
0x1a10   :  { %2689 = vtanh.f32 %v1524_v50 }
0x1a1a   :  { %v2690_v51 = vpop.eup %2689 }
0x1a1b   :  { %1528 = vrot.lane.b32.xlu0 %v2690_v51, %s2808_s3 }
0x1a8d   :  { %v1529_v53 = vpop.permute.xlu0 %1528 }
0x1a8e   :  { %v1531_v56 = vmul.f32 %v1529_v53, %v1526_v52 }
0x1a90   :  { %v1533_v57 = vadd.f32 %v1532_v54, %v1531_v56 }
0x1a92   :  { %1535 = vrot.lane.b32.xlu1 %v1533_v57, %s2808_s3 }
0x1b04   :  { %v1536_v58 = vpop.permute.xlu1 %1535 }
0x1b05   :  { %1539 = vst.msk [vmem:[#allocation9 + $0x2] sm:$0x3] %vm375_vm4, %v1536_v58  ;;  %2457 = vmatmul.mubr.msk.f32.vlgmr.msra.gmra.mrb[12].mxu0 %vm267_vm5, %v1536_v58 }
0x1b06   :  { %2596 = vmatpush3.bf16.msra.mxu0 %v3051_v38  ;;  %2478 = vmatprep.mubr.msk.f32.mxu0 %vm2805_vm0, %v2806_v4 }
0x1b07   :  { %2597 = vmatprep.subr.bf16.mxu0 %v2803_v1 }
0x1b0a   :  { %2599 = vmatpush3.bf16.msra.mxu0 %v3054_v11 }
0x1b0b   :  { %2606 = vmatprep.subr.bf16.mxu0 %v2803_v1 }
0x1bd8   :  { %v1609_v59 = vpop.f32.mrb[12].mxu0 }
0x1bd9   :  { %v1620_v60 = vadd.f32 %v1609_v59, %v3086_v55  ;;  %v2458_v61 = vpop.f32.mrb[13].mxu0  ;;  %v1613_v63 = vadd.f32 %v1609_v59, %v1540_v62 }
0x1bdb   :  { %1622 = vrot.lane.b32.xlu0 %v1620_v60, %s2807_s11  ;;  %v2222_v0 = vmul.f32 -1.442695, %v1613_v63  ;;  %v1858_v63 = vld [vmem:[#allocation2 + $0xa] sm:$0x3] }
0x1bdd   :  { %2691 = vpow2.f32 %v2222_v0 }
0x1be7   :  { %v2692_v2 = vpop.eup %2691 }
0x1be8   :  { %v1617_v3 = vadd.f32 1.0, %v2692_v2 }
0x1bea   :  { %2693 = vrcp.f32 %v1617_v3 }
0x1bf4   :  { %v2694_v5 = vpop.eup %2693 }
0x1bf5   :  { %v1632_v13 = vsub.f32 1.0, %v2694_v5  ;;  %v1638_v15 = vmul.f32 %v2694_v5, %v1533_v57 }
0x1c4d   :  { %v1623_v6 = vpop.permute.xlu0 %1622 }
0x1c4e   :  { %v1625_v7 = vmul.f32 %v2694_v5, %v1623_v6 }
0x1c50   :  { %1627 = vrot.lane.b32.xlu1 %v1625_v7, %s2807_s11 }
0x1cc2   :  { %v1628_v8 = vpop.permute.xlu1 %1627 }
0x1cc3   :  { %v1630_v9 = vadd.f32 %v1628_v8, %v1540_v62 }
0x1cc5   :  { %2695 = vtanh.f32 %v1630_v9 }
0x1ccf   :  { %v2696_v12 = vpop.eup %2695 }
0x1cd0   :  { %1634 = vrot.lane.b32.xlu0 %v2696_v12, %s2808_s3 }
0x1d42   :  { %v1635_v14 = vpop.permute.xlu0 %1634 }
0x1d43   :  { %v1637_v16 = vmul.f32 %v1635_v14, %v1632_v13 }
0x1d45   :  { %v1639_v17 = vadd.f32 %v1638_v15, %v1637_v16 }
0x1d47   :  { %1641 = vrot.lane.b32.xlu1 %v1639_v17, %s2808_s3 }
0x1db9   :  { %v1642_v18 = vpop.permute.xlu1 %1641 }
0x1dba   :  { %1645 = vst.msk [vmem:[#allocation9 + $0x4] sm:$0x3] %vm375_vm4, %v1642_v18  ;;  %2468 = vmatmul.mubr.msk.f32.vlgmr.msra.gmra.mrb[12].mxu1 %vm267_vm5, %v1642_v18 }
0x1dbb   :  { %2602 = vmatpush3.bf16.msra.mxu1 %v3051_v38  ;;  %2489 = vmatprep.mubr.msk.f32.mxu1 %vm2805_vm0, %v2806_v4 }
0x1dbc   :  { %2603 = vmatprep.subr.bf16.mxu1 %v2803_v1 }
0x1dbf   :  { %2605 = vmatpush3.bf16.msra.mxu1 %v3054_v11 }
0x1dc0   :  { %2612 = vmatprep.subr.bf16.mxu1 %v2803_v1 }
0x1e8d   :  { %v1715_v19 = vpop.f32.mrb[12].mxu1 }
0x1e8e   :  { %v1726_v21 = vadd.f32 %v1715_v19, %v3086_v55  ;;  %v2469_v22 = vpop.f32.mrb[13].mxu1  ;;  %v1719_v10 = vadd.f32 %v1715_v19, %v1646_v23  ;;  %v1964_v19 = vld [vmem:[#allocation2 + $0xc] sm:$0x3] }
0x1e90   :  { %1728 = vrot.lane.b32.xlu0 %v1726_v21, %s2807_s11  ;;  %v2224_v24 = vmul.f32 -1.442695, %v1719_v10 }
0x1e92   :  { %2697 = vpow2.f32 %v2224_v24 }
0x1e9c   :  { %v2698_v25 = vpop.eup %2697 }
0x1e9d   :  { %v1723_v26 = vadd.f32 1.0, %v2698_v25 }
0x1e9f   :  { %2699 = vrcp.f32 %v1723_v26 }
0x1ea9   :  { %v2700_v27 = vpop.eup %2699 }
0x1eaa   :  { %v1738_v33 = vsub.f32 1.0, %v2700_v27  ;;  %v1744_v36 = vmul.f32 %v2700_v27, %v1639_v17 }
0x1f02   :  { %v1729_v28 = vpop.permute.xlu0 %1728 }
0x1f03   :  { %v1731_v29 = vmul.f32 %v2700_v27, %v1729_v28 }
0x1f05   :  { %1733 = vrot.lane.b32.xlu1 %v1731_v29, %s2807_s11 }
0x1f77   :  { %v1734_v30 = vpop.permute.xlu1 %1733 }
0x1f78   :  { %v1736_v31 = vadd.f32 %v1734_v30, %v1646_v23 }
0x1f7a   :  { %2701 = vtanh.f32 %v1736_v31 }
0x1f84   :  { %v2702_v32 = vpop.eup %2701 }
0x1f85   :  { %1740 = vrot.lane.b32.xlu0 %v2702_v32, %s2808_s3 }
0x1ff7   :  { %v1741_v35 = vpop.permute.xlu0 %1740 }
0x1ff8   :  { %v1743_v34 = vmul.f32 %v1741_v35, %v1738_v33 }
0x1ffa   :  { %v1745_v37 = vadd.f32 %v1744_v36, %v1743_v34 }
0x1ffc   :  { %1747 = vrot.lane.b32.xlu1 %v1745_v37, %s2808_s3 }
0x206e   :  { %v1748_v39 = vpop.permute.xlu1 %1747 }
0x206f   :  { %1751 = vst.msk [vmem:[#allocation9 + $0x6] sm:$0x3] %vm375_vm4, %v1748_v39  ;;  %2479 = vmatmul.mubr.msk.f32.vlgmr.msra.gmra.mrb[14].mxu0 %vm267_vm5, %v1748_v39 }
0x2070   :  { %2608 = vmatpush3.bf16.msra.mxu0 %v3051_v38  ;;  %2500 = vmatprep.mubr.msk.f32.mxu0 %vm2805_vm0, %v2806_v4 }
0x2071   :  { %2609 = vmatprep.subr.bf16.mxu0 %v2803_v1 }
0x2074   :  { %2611 = vmatpush3.bf16.msra.mxu0 %v3054_v11 }
0x2142   :  { %v1821_v40 = vpop.f32.mrb[14].mxu0 }
0x2143   :  { %v1832_v41 = vadd.f32 %v1821_v40, %v3086_v55  ;;  %v2480_v42 = vpop.f32.mrb[15].mxu0  ;;  %v1825_v20 = vadd.f32 %v1821_v40, %v1752_v43  ;;  %v2070_v40 = vld [vmem:[#allocation2 + $0xe] sm:$0x3] }
0x2145   :  { %1834 = vrot.lane.b32.xlu0 %v1832_v41, %s2807_s11  ;;  %v2226_v44 = vmul.f32 -1.442695, %v1825_v20 }
0x2147   :  { %2703 = vpow2.f32 %v2226_v44 }
0x2151   :  { %v2704_v45 = vpop.eup %2703 }
0x2152   :  { %v1829_v46 = vadd.f32 1.0, %v2704_v45 }
0x2154   :  { %2705 = vrcp.f32 %v1829_v46 }
0x215e   :  { %v2706_v47 = vpop.eup %2705 }
0x215f   :  { %v1844_v53 = vsub.f32 1.0, %v2706_v47  ;;  %v1850_v56 = vmul.f32 %v2706_v47, %v1745_v37 }
0x21b7   :  { %v1835_v48 = vpop.permute.xlu0 %1834 }
0x21b8   :  { %v1837_v49 = vmul.f32 %v2706_v47, %v1835_v48 }
0x21ba   :  { %1839 = vrot.lane.b32.xlu1 %v1837_v49, %s2807_s11 }
0x222c   :  { %v1840_v50 = vpop.permute.xlu1 %1839 }
0x222d   :  { %v1842_v51 = vadd.f32 %v1840_v50, %v1752_v43 }
0x222f   :  { %2707 = vtanh.f32 %v1842_v51 }
0x2239   :  { %v2708_v52 = vpop.eup %2707 }
0x223a   :  { %1846 = vrot.lane.b32.xlu0 %v2708_v52, %s2808_s3 }
0x22ac   :  { %v1847_v54 = vpop.permute.xlu0 %1846 }
0x22ad   :  { %v1849_v57 = vmul.f32 %v1847_v54, %v1844_v53 }
0x22af   :  { %v1851_v58 = vadd.f32 %v1850_v56, %v1849_v57 }
0x22b1   :  { %1853 = vrot.lane.b32.xlu1 %v1851_v58, %s2808_s3 }
0x2323   :  { %v1854_v59 = vpop.permute.xlu1 %1853 }
0x2324   :  { %1857 = vst.msk [vmem:[#allocation9 + $0x8] sm:$0x3] %vm375_vm4, %v1854_v59  ;;  %2490 = vmatmul.mubr.msk.f32.vlgmr.msra.gmra.mrb[14].mxu1 %vm267_vm5, %v1854_v59 }
0x2325   :  { %2614 = vmatpush3.bf16.msra.mxu1 %v3051_v38  ;;  %2511 = vmatprep.mubr.msk.f32.mxu1 %vm2805_vm0, %v2806_v4 }
0x2326   :  { %2615 = vmatprep.subr.bf16.mxu1 %v2803_v1 }
0x2329   :  { %2617 = vmatpush3.bf16.msra.mxu1 %v3054_v11 }
0x23f7   :  { %v1927_v60 = vpop.f32.mrb[14].mxu1 }
0x23f8   :  { %v1938_v61 = vadd.f32 %v1927_v60, %v3086_v55  ;;  %v2491_v62 = vpop.f32.mrb[15].mxu1  ;;  %v1931_v0 = vadd.f32 %v1927_v60, %v1858_v63 }
0x23fa   :  { %1940 = vrot.lane.b32.xlu0 %v1938_v61, %s2807_s11  ;;  %v2228_v2 = vmul.f32 -1.442695, %v1931_v0 }
0x23fc   :  { %2709 = vpow2.f32 %v2228_v2 }
0x2406   :  { %v2710_v3 = vpop.eup %2709 }
0x2407   :  { %v1935_v5 = vadd.f32 1.0, %v2710_v3 }
0x2409   :  { %2711 = vrcp.f32 %v1935_v5 }
0x2413   :  { %v2712_v38 = vpop.eup %2711 }
0x2414   :  { %v1950_v8 = vsub.f32 1.0, %v2712_v38  ;;  %v1956_v12 = vmul.f32 %v2712_v38, %v1851_v58 }
0x246c   :  { %v1941_v6 = vpop.permute.xlu0 %1940 }
0x246d   :  { %v1943_v4 = vmul.f32 %v2712_v38, %v1941_v6 }
0x246f   :  { %1945 = vrot.lane.b32.xlu1 %v1943_v4, %s2807_s11 }
0x24e1   :  { %v1946_v1 = vpop.permute.xlu1 %1945 }
0x24e2   :  { %v1948_v11 = vadd.f32 %v1946_v1, %v1858_v63 }
0x24e4   :  { %2713 = vtanh.f32 %v1948_v11 }
0x24ee   :  { %v2714_v7 = vpop.eup %2713 }
0x24ef   :  { %1952 = vrot.lane.b32.xlu0 %v2714_v7, %s2808_s3 }
0x2561   :  { %v1953_v9 = vpop.permute.xlu0 %1952 }
0x2562   :  { %v1955_v13 = vmul.f32 %v1953_v9, %v1950_v8 }
0x2564   :  { %v1957_v14 = vadd.f32 %v1956_v12, %v1955_v13 }
0x2566   :  { %1959 = vrot.lane.b32.xlu1 %v1957_v14, %s2808_s3 }
0x25d8   :  { %v1960_v15 = vpop.permute.xlu1 %1959 }
0x25d9   :  { %1963 = vst.msk [vmem:[#allocation9 + $0xa] sm:$0x3] %vm375_vm4, %v1960_v15  ;;  %2501 = vmatmul.mubr.msk.f32.vlgmr.msra.gmra.mrb[16].mxu0 %vm267_vm5, %v1960_v15 }
0x26ac   :  { %v2033_v16 = vpop.f32.mrb[16].mxu0 }
0x26ad   :  { %v2044_v17 = vadd.f32 %v2033_v16, %v3086_v55  ;;  %v2502_v18 = vpop.f32.mrb[17].mxu0  ;;  %v2037_v21 = vadd.f32 %v2033_v16, %v1964_v19 }
0x26af   :  { %2046 = vrot.lane.b32.xlu0 %v2044_v17, %s2807_s11  ;;  %v2230_v22 = vmul.f32 -1.442695, %v2037_v21 }
0x26b1   :  { %2715 = vpow2.f32 %v2230_v22 }
0x26bb   :  { %v2716_v23 = vpop.eup %2715 }
0x26bc   :  { %v2041_v10 = vadd.f32 1.0, %v2716_v23 }
0x26be   :  { %2717 = vrcp.f32 %v2041_v10 }
0x26c8   :  { %v2718_v24 = vpop.eup %2717 }
0x26c9   :  { %v2056_v30 = vsub.f32 1.0, %v2718_v24  ;;  %v2062_v32 = vmul.f32 %v2718_v24, %v1957_v14 }
0x2721   :  { %v2047_v25 = vpop.permute.xlu0 %2046 }
0x2722   :  { %v2049_v26 = vmul.f32 %v2718_v24, %v2047_v25 }
0x2724   :  { %2051 = vrot.lane.b32.xlu1 %v2049_v26, %s2807_s11 }
0x2796   :  { %v2052_v27 = vpop.permute.xlu1 %2051 }
0x2797   :  { %v2054_v28 = vadd.f32 %v2052_v27, %v1964_v19 }
0x2799   :  { %2719 = vtanh.f32 %v2054_v28 }
0x27a3   :  { %v2720_v29 = vpop.eup %2719 }
0x27a4   :  { %2058 = vrot.lane.b32.xlu0 %v2720_v29, %s2808_s3 }
0x2816   :  { %v2059_v31 = vpop.permute.xlu0 %2058 }
0x2817   :  { %v2061_v33 = vmul.f32 %v2059_v31, %v2056_v30 }
0x2819   :  { %v2063_v35 = vadd.f32 %v2062_v32, %v2061_v33 }
0x281b   :  { %2065 = vrot.lane.b32.xlu1 %v2063_v35, %s2808_s3 }
0x288d   :  { %v2066_v36 = vpop.permute.xlu1 %2065 }
0x288e   :  { %2069 = vst.msk [vmem:[#allocation9 + $0xc] sm:$0x3] %vm375_vm4, %v2066_v36  ;;  %2512 = vmatmul.mubr.msk.f32.vlgmr.msra.gmra.mrb[16].mxu1 %vm267_vm5, %v2066_v36 }
0x2961   :  { %v2139_v34 = vpop.f32.mrb[16].mxu1 }
0x2962   :  { %v2150_v37 = vadd.f32 %v2139_v34, %v3086_v55  ;;  %v2513_v39 = vpop.f32.mrb[17].mxu1  ;;  %v2143_v41 = vadd.f32 %v2139_v34, %v2070_v40 }
0x2964   :  { %2152 = vrot.lane.b32.xlu0 %v2150_v37, %s2807_s11  ;;  %v2232_v42 = vmul.f32 -1.442695, %v2143_v41 }
0x2966   :  { %2721 = vpow2.f32 %v2232_v42 }
0x2970   :  { %v2722_v43 = vpop.eup %2721 }
0x2971   :  { %v2147_v20 = vadd.f32 1.0, %v2722_v43 }
0x2973   :  { %2723 = vrcp.f32 %v2147_v20 }
0x297d   :  { %v2724_v44 = vpop.eup %2723 }
0x297e   :  { %v2162_v55 = vsub.f32 1.0, %v2724_v44  ;;  %v2168_v51 = vmul.f32 %v2724_v44, %v2063_v35 }
0x29d6   :  { %v2153_v45 = vpop.permute.xlu0 %2152 }
0x29d7   :  { %v2155_v46 = vmul.f32 %v2724_v44, %v2153_v45 }
0x29d9   :  { %2157 = vrot.lane.b32.xlu1 %v2155_v46, %s2807_s11 }
0x2a4b   :  { %v2158_v47 = vpop.permute.xlu1 %2157 }
0x2a4c   :  { %v2160_v48 = vadd.f32 %v2158_v47, %v2070_v40 }
0x2a4e   :  { %2725 = vtanh.f32 %v2160_v48 }
0x2a58   :  { %v2726_v49 = vpop.eup %2725 }
0x2a59   :  { %2164 = vrot.lane.b32.xlu0 %v2726_v49, %s2808_s3 }
0x2acb   :  { %v2165_v50 = vpop.permute.xlu0 %2164 }
0x2acc   :  { %v2167_v52 = vmul.f32 %v2165_v50, %v2162_v55 }
0x2ace   :  { %v2169_v53 = vadd.f32 %v2168_v51, %v2167_v52 }
0x2ad0   :  { %2171 = vrot.lane.b32.xlu1 %v2169_v53, %s2808_s3 }
0x2b42   :  { %v2172_v54 = vpop.permute.xlu1 %2171 }
0x2b43   :  { %2175 = vst.msk [vmem:[#allocation9 + $0xe] sm:$0x3] %vm375_vm4, %v2172_v54 }
0x2b44   :  { %2782 = shalt.err (!%p2779_p6)
}
0x2b45   :  { %s2783_s22 = scalar_lea.hbm %s3216_s9, 256 }
0x2b46   :  { %p2784_p7 = scmp.ne.s32.totalorder %s3216_s9, %s2783_s22  ;;  %p2787_p8 = scmp.lt.u32.totalorder %s2783_s22, %s3216_s9 }
0x2b48   :  { %p2789_p9 = pnand %p2787_p8, %p2784_p7 }
0x2b4a   :  { %2792 = shalt.err (!%p2789_p9)
}
0x2b4b   :  { %s2810_s27 = smov 32   ;;  %s2811_s28 = smov 2  }
0x2b4c   :  { %2187 = dma.vmem_to_hbm [thread:$0]  %s2182_s19, 256, %s3216_s9, [#allocation6], %s2810_s27, %s2810_s27, %s2811_s28  }
0x2b4d   :  { %2797 = dma.done.wait [#allocation6], 256  }
0x2b4e   :  { %2798 = vsyncadd [#allocation6], 4294967040 }
0x2b4f   :  { %2191 = vsyncpa [#allocation5], 1 }
0x2b50   :  { %2192 = vsyncpa [#allocation8], 1 }
0x2b51   :  { %2193 = vsyncpa [#allocation6], 1 }

</bundles_post_ra>
